<compile_context>
chip_gen: v6e
topology: v6e:2x2x1
jax: 0.10.0
libtpu: 0.0.40
codegen_flags: <defaults>
</compile_context>

<pallas_src>
import functools

import jax
import jax.numpy as jnp
from jax.experimental import pallas as pl
from jax.experimental.pallas import tpu as pltpu


def _round_up(x, m):
    return ((x + m - 1) // m) * m


# ---------------------------------------------------------------------------
# Fused kernel: all RNN(relu) layers + decoder linear, one invocation.
# All shapes below are the padded (TPU-friendly) shapes.
# ---------------------------------------------------------------------------
def _darrnn_fused_kernel(x_ref, wih0_ref, wih_ref, whh_ref, b_ref, h0_ref,
                         dec_w_ref, dec_b_ref,
                         dec_ref, hlast_ref,
                         xp_ref):
    """Padded shapes (all static):
      x_ref    : (T, B, Du)          input sequence (Du = padded utt width)
      wih0_ref : (Du, D)             layer-0 W_ih (transposed)
      wih_ref  : (max(L-1,1), D, D)  W_ih of layers 1..L-1 (dummy if L == 1)
      whh_ref  : (L, D, D)           W_hh per layer
      b_ref    : (L, 1, D)           b_ih + b_hh per layer (f32)
      h0_ref   : (L, B, D)           initial hidden state (f32)
      dec_w_ref: (D, N)              decoder weight (transposed)
      dec_b_ref: (1, N)              decoder bias (f32)
      dec_ref  : (T*B, N)            OUT: decoded logits, flattened over (t,b)
      hlast_ref: (L, B, D)           OUT: final hidden per layer
      xp_ref   : (2, T*B, D) f32     scratch: input projections, ping-pong
    """
    T, B, Du = x_ref.shape
    n_layers, _, D = whh_ref.shape
    mxu_dtype = whh_ref.dtype          # f32, or bf16 on v6e/v7x

    # Layer-0 input projection + bias hoisted out of the recurrence: one big
    # MXU matmul, staged into VMEM scratch.  Per-step reads below are static
    # 8-row (sublane-aligned) slices -> bounded live ranges, unmasked vld.
    x_flat = x_ref[...].reshape(T * B, Du).astype(mxu_dtype)
    xp_ref[0] = (jnp.dot(x_flat, wih0_ref[...],
                         preferred_element_type=jnp.float32) + b_ref[0])

    for layer in range(n_layers):                  # static -> unrolled
        cur = layer % 2
        nxt = (layer + 1) % 2
        xp_cur = xp_ref.at[cur]
        xp_nxt = xp_ref.at[nxt]
        w_hh = whh_ref[layer]                      # (D, D), mxu_dtype
        last = layer == n_layers - 1
        if last:
            dec_w = dec_w_ref[...]                 # (D, N), mxu_dtype
            dec_b = dec_b_ref[...]                 # (1, N), f32
        else:
            w_ih_nx = wih_ref[layer]               # next layer's W_ih (D, D)
            b_nx = b_ref[layer + 1]                # (1, D), f32

        h = h0_ref[layer]                          # (B, D), f32 carried state
        # T is small & static here -> fully unrolled (slice starts are
        # compile-time constants).  For large T use lax.fori_loop with a
        # small unroll + pl.multiple_of on the pl.ds starts.
        for t in range(T):
            row = t * B                            # static, sublane-aligned
            # The ONLY serially-dependent matmul: h_t = relu(x_t W + h W_hh).
            pre = xp_cur[pl.ds(row, B), :] + jnp.dot(
                h.astype(mxu_dtype), w_hh,
                preferred_element_type=jnp.float32)
            h = jnp.maximum(pre, 0.0)              # relu nonlinearity
            h_mxu = h.astype(mxu_dtype)
            # Independent MXU work issued right after h_t is available:
            # it does not depend on h_{t+1}, so it overlaps the drain of the
            # next dependent h @ W_hh instead of forming a separate tail.
            if last:
                dec_ref[pl.ds(row, B), :] = (
                    jnp.dot(h_mxu, dec_w, preferred_element_type=jnp.float32)
                    + dec_b).astype(dec_ref.dtype)
            else:
                xp_nxt[pl.ds(row, B), :] = (
                    jnp.dot(h_mxu, w_ih_nx,
                            preferred_element_type=jnp.float32) + b_nx)

        hlast_ref[layer] = h.astype(hlast_ref.dtype)   # once per layer


# ---------------------------------------------------------------------------
# DARRNN forward (wrapper: pad -> fused kernel -> slice)
# ---------------------------------------------------------------------------
@functools.partial(jax.jit, static_argnames=("n_layers", "mxu_dtype"))
def darrnn_forward(x, hidden, params, n_layers, mxu_dtype=jnp.float32):
    """
    x:      (T, B, utt_size)
    hidden: (n_layers, B, hidden_size)
    returns (decoded (T, B, n_tags), new_hidden (n_layers, B, hidden_size))
    mxu_dtype: dtype fed to the MXU (jnp.bfloat16 recommended on v6e/v7x);
               accumulation and the carried hidden state stay f32.
    """
    T, B, utt = x.shape
    H = hidden.shape[-1]
    n_tags = params["dec_w"].shape[1]

    # Padded sizes: batch -> sublane multiple (8), features -> lane multiple
    # (128).  Layer 0 gets its own contraction width Du (no waste when
    # utt_size != hidden_size).
    B_p = _round_up(max(B, 8), 8)
    Du = _round_up(max(utt, 128), 128)
    D = _round_up(max(H, 128), 128)
    N_p = _round_up(max(n_tags, 128), 128)
    L1 = max(n_layers - 1, 1)

    x_p = jnp.pad(x, ((0, 0), (0, B_p - B), (0, Du - utt))).astype(mxu_dtype)
    h0_p = jnp.pad(hidden, ((0, 0), (0, B_p - B), (0, D - H)))
    w_ih0, _, _ = params["rnn"][0]
    wih0_p = jnp.pad(w_ih0, ((0, Du - utt), (0, D - H))).astype(mxu_dtype)
    if n_layers > 1:
        wih_p = jnp.stack([jnp.pad(w, ((0, D - H), (0, D - H)))
                           for (w, _, _) in params["rnn"][1:]]).astype(mxu_dtype)
    else:
        wih_p = jnp.zeros((1, D, D), mxu_dtype)          # never read
    whh_p = jnp.stack([jnp.pad(w, ((0, D - H), (0, D - H)))
                       for (_, w, _) in params["rnn"]]).astype(mxu_dtype)
    b_p = jnp.stack([jnp.pad(b, ((0, 0), (0, D - H)))
                     for (_, _, b) in params["rnn"]]).astype(jnp.float32)
    dec_w_p = jnp.pad(params["dec_w"],
                      ((0, D - H), (0, N_p - n_tags))).astype(mxu_dtype)
    dec_b_p = jnp.pad(params["dec_b"],
                      ((0, 0), (0, N_p - n_tags))).astype(jnp.float32)

    # Advisory cost estimate so XLA schedules the wrapper pads/slices around
    # the long-running custom call instead of serializing on it.
    flops = (2 * T * B_p * Du * D                       # layer-0 projection
             + 2 * n_layers * T * B_p * D * D           # recurrent h @ W_hh
             + 2 * (n_layers - 1) * T * B_p * D * D     # inline next-layer proj
             + 2 * T * B_p * D * N_p)                   # decoder
    in_bytes = sum(int(a.size) * a.dtype.itemsize
                   for a in (x_p, wih0_p, wih_p, whh_p, b_p, h0_p,
                             dec_w_p, dec_b_p))
    out_bytes = (T * B_p * N_p + n_layers * B_p * D) * 4
    cost = pl.CostEstimate(flops=flops, transcendentals=0,
                           bytes_accessed=in_bytes + out_bytes)

    dec_p, hlast_p = pl.pallas_call(
        _darrnn_fused_kernel,
        out_shape=(jax.ShapeDtypeStruct((T * B_p, N_p), jnp.float32),
                   jax.ShapeDtypeStruct((n_layers, B_p, D), jnp.float32)),
        grid_spec=pltpu.PrefetchScalarGridSpec(
            num_scalar_prefetch=0,
            grid=(1,),
            in_specs=[
                pl.BlockSpec((T, B_p, Du), lambda i: (0, 0, 0)),        # x
                pl.BlockSpec((Du, D), lambda i: (0, 0)),                # W_ih[0]
                pl.BlockSpec((L1, D, D), lambda i: (0, 0, 0)),          # W_ih[1:]
                pl.BlockSpec((n_layers, D, D), lambda i: (0, 0, 0)),    # W_hh
                pl.BlockSpec((n_layers, 1, D), lambda i: (0, 0, 0)),    # bias
                pl.BlockSpec((n_layers, B_p, D), lambda i: (0, 0, 0)),  # h0
                pl.BlockSpec((D, N_p), lambda i: (0, 0)),               # dec W
                pl.BlockSpec((1, N_p), lambda i: (0, 0)),               # dec b
            ],
            out_specs=(
                pl.BlockSpec((T * B_p, N_p), lambda i: (0, 0)),         # decoded
                pl.BlockSpec((n_layers, B_p, D), lambda i: (0, 0, 0)),  # h_last
            ),
            # Ping-pong input-projection slab (current layer read / next
            # layer write), f32 accumulated.
            scratch_shapes=[pltpu.VMEM((2, T * B_p, D), jnp.float32)],
        ),
        # Recurrence is inherently sequential; single grid point at these
        # sizes.  (v7x: split B_p over a leading "parallel" axis once the
        # batch is big enough to feed both TensorCores.)
        compiler_params=pltpu.CompilerParams(
            dimension_semantics=("arbitrary",)),
        cost_estimate=cost,
    )(x_p, wih0_p, wih_p, whh_p, b_p, h0_p, dec_w_p, dec_b_p)

    decoded = dec_p.reshape(T, B_p, N_p)[:, :B, :n_tags]
    new_hidden = hlast_p[:, :B, :H]
    return decoded, new_hidden


# ---------------------------------------------------------------------------
# Pure-JAX reference (for correctness check)
# ---------------------------------------------------------------------------
def darrnn_reference(x, hidden, params, n_layers):
    dot = functools.partial(jnp.matmul, precision=jax.lax.Precision.HIGHEST)
    layer_in = x
    hs = []
    for layer in range(n_layers):
        w_ih, w_hh, b = params["rnn"][layer]
        h = hidden[layer]
        outs = []
        for t in range(x.shape[0]):
            h = jax.nn.relu(dot(layer_in[t], w_ih) + dot(h, w_hh) + b)
            outs.append(h)
        hs.append(h)
        layer_in = jnp.stack(outs, axis=0)
    T, B, H = layer_in.shape
    dec = dot(layer_in.reshape(T * B, H), params["dec_w"]) + params["dec_b"]
    return dec.reshape(T, B, -1), jnp.stack(hs, axis=0)


# ---------------------------------------------------------------------------
# Deterministic parameter initialization (mirrors nn.RNN / init_weights)
# ---------------------------------------------------------------------------
def init_params(key, utt_size, hidden_size, n_tags, n_layers):
    params = {"rnn": []}
    bound = 1.0 / jnp.sqrt(hidden_size)
    for layer in range(n_layers):
        in_dim = utt_size if layer == 0 else hidden_size
        key, k1, k2, k3, k4 = jax.random.split(key, 5)
        # stored transposed: (in, out) so kernel does x @ W
        w_ih = jax.random.uniform(k1, (in_dim, hidden_size), jnp.float32,
                                  -bound, bound)
        w_hh = jax.random.uniform(k2, (hidden_size, hidden_size), jnp.float32,
                                  -bound, bound)
        b_ih = jax.random.uniform(k3, (hidden_size,), jnp.float32, -bound, bound)
        b_hh = jax.random.uniform(k4, (hidden_size,), jnp.float32, -bound, bound)
        params["rnn"].append((w_ih, w_hh, (b_ih + b_hh).reshape(1, hidden_size)))
    key, kd = jax.random.split(key)
    # decoder: weight uniform(-0.1, 0.1), bias zero (per init_weights)
    params["dec_w"] = jax.random.uniform(kd, (hidden_size, n_tags), jnp.float32,
                                         -0.1, 0.1)
    params["dec_b"] = jnp.zeros((1, n_tags), jnp.float32)
    return params


if __name__ == "__main__":
    utt_size, hidden_size, n_tags, n_layers = 16, 32, 12, 2
    T, B = 8, 2

    key = jax.random.PRNGKey(0)
    key, kx = jax.random.split(key)
    x = jax.random.normal(kx, (T, B, utt_size), jnp.float32)
    hidden = jnp.zeros((n_layers, B, hidden_size), jnp.float32)  # init_hidden

    params = init_params(key, utt_size, hidden_size, n_tags, n_layers)

    # f32 MXU path: full correctness check against the pure-JAX reference.
    decoded, new_hidden = darrnn_forward(x, hidden, params, n_layers)
    jax.block_until_ready((decoded, new_hidden))

    ref_dec, ref_hid = darrnn_reference(x, hidden, params, n_layers)

    assert decoded.shape == (T, B, n_tags)
    assert new_hidden.shape == (n_layers, B, hidden_size)
    assert jnp.allclose(decoded, ref_dec, rtol=1e-2, atol=1e-2)
    assert jnp.allclose(new_hidden, ref_hid, rtol=1e-2, atol=1e-2)

    # bf16-weight MXU path (recommended on v6e/v7x): smoke run + loose check.
    dec_bf16, hid_bf16 = darrnn_forward(x, hidden, params, n_layers,
                                        mxu_dtype=jnp.bfloat16)
    jax.block_until_ready((dec_bf16, hid_bf16))
    assert dec_bf16.shape == (T, B, n_tags)
    assert jnp.allclose(dec_bf16, ref_dec, rtol=1e-1, atol=1e-1)

    print("KERNEL_OK")
</pallas_src>

<mosaic_0001>
module attributes {stable_mosaic.version = 11 : i64} {
  func.func @_darrnn_fused_kernel(%arg0: i32, %arg1: memref<8x8x128xf32, #tpu.memory_space<vmem>>, %arg2: memref<128x128xf32, #tpu.memory_space<vmem>>, %arg3: memref<1x128x128xf32, #tpu.memory_space<vmem>>, %arg4: memref<2x128x128xf32, #tpu.memory_space<vmem>>, %arg5: memref<2x1x128xf32, #tpu.memory_space<vmem>>, %arg6: memref<2x8x128xf32, #tpu.memory_space<vmem>>, %arg7: memref<128x128xf32, #tpu.memory_space<vmem>>, %arg8: memref<1x128xf32, #tpu.memory_space<vmem>>, %arg9: memref<64x128xf32, #tpu.memory_space<vmem>>, %arg10: memref<2x8x128xf32, #tpu.memory_space<vmem>>, %arg11: memref<2x64x128xf32, #tpu.memory_space<vmem>>) attributes {dimension_semantics = [#tpu.dimension_semantics<arbitrary>], iteration_bounds = array<i64: 1>, scalar_prefetch = 0 : i64, scratch_operands = 1 : i64, tpu.core_type = #tpu.core_type<tc>, window_params = [{pipeline_mode = #tpu.pipeline_mode<synchronous>, transform_indices = @transform_0, window_bounds = array<i64: 8, 8, 128>}, {pipeline_mode = #tpu.pipeline_mode<synchronous>, transform_indices = @transform_1, window_bounds = array<i64: 128, 128>}, {pipeline_mode = #tpu.pipeline_mode<synchronous>, transform_indices = @transform_2, window_bounds = array<i64: 1, 128, 128>}, {pipeline_mode = #tpu.pipeline_mode<synchronous>, transform_indices = @transform_3, window_bounds = array<i64: 2, 128, 128>}, {pipeline_mode = #tpu.pipeline_mode<synchronous>, transform_indices = @transform_4, window_bounds = array<i64: 2, 1, 128>}, {pipeline_mode = #tpu.pipeline_mode<synchronous>, transform_indices = @transform_5, window_bounds = array<i64: 2, 8, 128>}, {pipeline_mode = #tpu.pipeline_mode<synchronous>, transform_indices = @transform_6, window_bounds = array<i64: 128, 128>}, {pipeline_mode = #tpu.pipeline_mode<synchronous>, transform_indices = @transform_7, window_bounds = array<i64: 1, 128>}, {pipeline_mode = #tpu.pipeline_mode<synchronous>, transform_indices = @transform_8, window_bounds = array<i64: 64, 128>}, {pipeline_mode = #tpu.pipeline_mode<synchronous>, transform_indices = @transform_9, window_bounds = array<i64: 2, 8, 128>}]} {
    %c0 = arith.constant 0 : index
    %c0_0 = arith.constant 0 : index
    %c0_1 = arith.constant 0 : index
    %0 = vector.load %arg1[%c0, %c0_0, %c0_1] : memref<8x8x128xf32, #tpu.memory_space<vmem>>, vector<8x8x128xf32>
    %1 = vector.shape_cast %0 : vector<8x8x128xf32> to vector<64x128xf32>
    %c0_2 = arith.constant 0 : index
    %c0_3 = arith.constant 0 : index
    %2 = vector.load %arg2[%c0_2, %c0_3] : memref<128x128xf32, #tpu.memory_space<vmem>>, vector<128x128xf32>
    %cst = arith.constant dense<0.000000e+00> : vector<64x128xf32>
    %3 = tpu.matmul %1, %2, %cst {dimension_numbers = #tpu.dot_dimension_numbers<[1], [0], [0], [1], [0, 0, 1, 1], [], []>} : vector<64x128xf32>, vector<128x128xf32>, vector<64x128xf32> -> vector<64x128xf32>
    %c0_4 = arith.constant 0 : index
    %c0_5 = arith.constant 0 : index
    %c0_6 = arith.constant 0 : index
    %4 = vector.load %arg5[%c0_4, %c0_5, %c0_6] : memref<2x1x128xf32, #tpu.memory_space<vmem>>, vector<1x1x128xf32>
    %5 = vector.shape_cast %4 : vector<1x1x128xf32> to vector<1x128xf32>
    %6 = vector.broadcast %5 : vector<1x128xf32> to vector<64x128xf32>
    %7 = arith.addf %3, %6 : vector<64x128xf32>
    %c0_7 = arith.constant 0 : index
    %c0_8 = arith.constant 0 : index
    %c0_9 = arith.constant 0 : index
    %8 = vector.load %arg11[%c0_7, %c0_8, %c0_9] : memref<2x64x128xf32, #tpu.memory_space<vmem>>, vector<1x64x128xf32>
    %9 = vector.shape_cast %8 : vector<1x64x128xf32> to vector<64x128xf32>
    %10 = vector.shape_cast %7 : vector<64x128xf32> to vector<1x64x128xf32>
    tpu.vector_store %arg11[%c0_7, %c0_8, %c0_9], %10 {strides = array<i32>} : memref<2x64x128xf32, #tpu.memory_space<vmem>>, vector<1x64x128xf32>,
    %c0_10 = arith.constant 0 : index
    %c0_11 = arith.constant 0 : index
    %c0_12 = arith.constant 0 : index
    %11 = vector.load %arg4[%c0_10, %c0_11, %c0_12] : memref<2x128x128xf32, #tpu.memory_space<vmem>>, vector<1x128x128xf32>
    %12 = vector.shape_cast %11 : vector<1x128x128xf32> to vector<128x128xf32>
    %c0_13 = arith.constant 0 : index
    %c0_14 = arith.constant 0 : index
    %c0_15 = arith.constant 0 : index
    %13 = vector.load %arg3[%c0_13, %c0_14, %c0_15] : memref<1x128x128xf32, #tpu.memory_space<vmem>>, vector<1x128x128xf32>
    %14 = vector.shape_cast %13 : vector<1x128x128xf32> to vector<128x128xf32>
    %c1 = arith.constant 1 : index
    %c0_16 = arith.constant 0 : index
    %c0_17 = arith.constant 0 : index
    %15 = vector.load %arg5[%c1, %c0_16, %c0_17] : memref<2x1x128xf32, #tpu.memory_space<vmem>>, vector<1x1x128xf32>
    %16 = vector.shape_cast %15 : vector<1x1x128xf32> to vector<1x128xf32>
    %c0_18 = arith.constant 0 : index
    %c0_19 = arith.constant 0 : index
    %c0_20 = arith.constant 0 : index
    %17 = vector.load %arg6[%c0_18, %c0_19, %c0_20] : memref<2x8x128xf32, #tpu.memory_space<vmem>>, vector<1x8x128xf32>
    %18 = vector.shape_cast %17 : vector<1x8x128xf32> to vector<8x128xf32>
    %c0_i32 = arith.constant 0 : i32
    %c0_i32_21 = arith.constant 0 : i32
    %c0_i32_22 = arith.constant 0 : i32
    %19 = tpu.memref_slice %arg11[%c0_i32, %c0_i32_21, %c0_i32_22] : memref<2x64x128xf32, #tpu.memory_space<vmem>> -> memref<1x64x128xf32, #tpu.memory_space<vmem>>
    %20 = tpu.memref_squeeze %19 : memref<1x64x128xf32, #tpu.memory_space<vmem>> -> memref<64x128xf32, #tpu.memory_space<vmem>>
    %c0_23 = arith.constant 0 : index
    %c0_24 = arith.constant 0 : index
    %21 = vector.load %20[%c0_23, %c0_24] : memref<64x128xf32, #tpu.memory_space<vmem>>, vector<8x128xf32>
    %cst_25 = arith.constant dense<0.000000e+00> : vector<8x128xf32>
    %22 = tpu.matmul %18, %12, %cst_25 {dimension_numbers = #tpu.dot_dimension_numbers<[1], [0], [0], [1], [0, 0, 1, 1], [], []>} : vector<8x128xf32>, vector<128x128xf32>, vector<8x128xf32> -> vector<8x128xf32>
    %23 = arith.addf %21, %22 : vector<8x128xf32>
    %cst_26 = arith.constant 0.000000e+00 : f32
    %24 = vector.broadcast %cst_26 : f32 to vector<8x128xf32>
    %25 = arith.maximumf %23, %24 : vector<8x128xf32>
    %cst_27 = arith.constant dense<0.000000e+00> : vector<8x128xf32>
    %26 = tpu.matmul %25, %14, %cst_27 {dimension_numbers = #tpu.dot_dimension_numbers<[1], [0], [0], [1], [0, 0, 1, 1], [], []>} : vector<8x128xf32>, vector<128x128xf32>, vector<8x128xf32> -> vector<8x128xf32>
    %27 = vector.broadcast %16 : vector<1x128xf32> to vector<8x128xf32>
    %28 = arith.addf %26, %27 : vector<8x128xf32>
    %c1_i32 = arith.constant 1 : i32
    %c0_i32_28 = arith.constant 0 : i32
    %c0_i32_29 = arith.constant 0 : i32
    %29 = tpu.memref_slice %arg11[%c1_i32, %c0_i32_28, %c0_i32_29] : memref<2x64x128xf32, #tpu.memory_space<vmem>> -> memref<1x64x128xf32, #tpu.memory_space<vmem>>
    %30 = tpu.memref_squeeze %29 : memref<1x64x128xf32, #tpu.memory_space<vmem>> -> memref<64x128xf32, #tpu.memory_space<vmem>>
    %c0_30 = arith.constant 0 : index
    %c0_31 = arith.constant 0 : index
    %31 = vector.load %30[%c0_30, %c0_31] : memref<64x128xf32, #tpu.memory_space<vmem>>, vector<8x128xf32>
    tpu.vector_store %30[%c0_30, %c0_31], %28 {strides = array<i32>} : memref<64x128xf32, #tpu.memory_space<vmem>>, vector<8x128xf32>,
    %c0_i32_32 = arith.constant 0 : i32
    %c0_i32_33 = arith.constant 0 : i32
    %c0_i32_34 = arith.constant 0 : i32
    %32 = tpu.memref_slice %arg11[%c0_i32_32, %c0_i32_33, %c0_i32_34] : memref<2x64x128xf32, #tpu.memory_space<vmem>> -> memref<1x64x128xf32, #tpu.memory_space<vmem>>
    %33 = tpu.memref_squeeze %32 : memref<1x64x128xf32, #tpu.memory_space<vmem>> -> memref<64x128xf32, #tpu.memory_space<vmem>>
    %c8 = arith.constant 8 : index
    %c0_35 = arith.constant 0 : index
    %34 = vector.load %33[%c8, %c0_35] : memref<64x128xf32, #tpu.memory_space<vmem>>, vector<8x128xf32>
    %cst_36 = arith.constant dense<0.000000e+00> : vector<8x128xf32>
    %35 = tpu.matmul %25, %12, %cst_36 {dimension_numbers = #tpu.dot_dimension_numbers<[1], [0], [0], [1], [0, 0, 1, 1], [], []>} : vector<8x128xf32>, vector<128x128xf32>, vector<8x128xf32> -> vector<8x128xf32>
    %36 = arith.addf %34, %35 : vector<8x128xf32>
    %cst_37 = arith.constant 0.000000e+00 : f32
    %37 = vector.broadcast %cst_37 : f32 to vector<8x128xf32>
    %38 = arith.maximumf %36, %37 : vector<8x128xf32>
    %cst_38 = arith.constant dense<0.000000e+00> : vector<8x128xf32>
    %39 = tpu.matmul %38, %14, %cst_38 {dimension_numbers = #tpu.dot_dimension_numbers<[1], [0], [0], [1], [0, 0, 1, 1], [], []>} : vector<8x128xf32>, vector<128x128xf32>, vector<8x128xf32> -> vector<8x128xf32>
    %40 = vector.broadcast %16 : vector<1x128xf32> to vector<8x128xf32>
    %41 = arith.addf %39, %40 : vector<8x128xf32>
    %c1_i32_39 = arith.constant 1 : i32
    %c0_i32_40 = arith.constant 0 : i32
    %c0_i32_41 = arith.constant 0 : i32
    %42 = tpu.memref_slice %arg11[%c1_i32_39, %c0_i32_40, %c0_i32_41] : memref<2x64x128xf32, #tpu.memory_space<vmem>> -> memref<1x64x128xf32, #tpu.memory_space<vmem>>
    %43 = tpu.memref_squeeze %42 : memref<1x64x128xf32, #tpu.memory_space<vmem>> -> memref<64x128xf32, #tpu.memory_space<vmem>>
    %c8_42 = arith.constant 8 : index
    %c0_43 = arith.constant 0 : index
    %44 = vector.load %43[%c8_42, %c0_43] : memref<64x128xf32, #tpu.memory_space<vmem>>, vector<8x128xf32>
    tpu.vector_store %43[%c8_42, %c0_43], %41 {strides = array<i32>} : memref<64x128xf32, #tpu.memory_space<vmem>>, vector<8x128xf32>,
    %c0_i32_44 = arith.constant 0 : i32
    %c0_i32_45 = arith.constant 0 : i32
    %c0_i32_46 = arith.constant 0 : i32
    %45 = tpu.memref_slice %arg11[%c0_i32_44, %c0_i32_45, %c0_i32_46] : memref<2x64x128xf32, #tpu.memory_space<vmem>> -> memref<1x64x128xf32, #tpu.memory_space<vmem>>
    %46 = tpu.memref_squeeze %45 : memref<1x64x128xf32, #tpu.memory_space<vmem>> -> memref<64x128xf32, #tpu.memory_space<vmem>>
    %c16 = arith.constant 16 : index
    %c0_47 = arith.constant 0 : index
    %47 = vector.load %46[%c16, %c0_47] : memref<64x128xf32, #tpu.memory_space<vmem>>, vector<8x128xf32>
    %cst_48 = arith.constant dense<0.000000e+00> : vector<8x128xf32>
    %48 = tpu.matmul %38, %12, %cst_48 {dimension_numbers = #tpu.dot_dimension_numbers<[1], [0], [0], [1], [0, 0, 1, 1], [], []>} : vector<8x128xf32>, vector<128x128xf32>, vector<8x128xf32> -> vector<8x128xf32>
    %49 = arith.addf %47, %48 : vector<8x128xf32>
    %cst_49 = arith.constant 0.000000e+00 : f32
    %50 = vector.broadcast %cst_49 : f32 to vector<8x128xf32>
    %51 = arith.maximumf %49, %50 : vector<8x128xf32>
    %cst_50 = arith.constant dense<0.000000e+00> : vector<8x128xf32>
    %52 = tpu.matmul %51, %14, %cst_50 {dimension_numbers = #tpu.dot_dimension_numbers<[1], [0], [0], [1], [0, 0, 1, 1], [], []>} : vector<8x128xf32>, vector<128x128xf32>, vector<8x128xf32> -> vector<8x128xf32>
    %53 = vector.broadcast %16 : vector<1x128xf32> to vector<8x128xf32>
    %54 = arith.addf %52, %53 : vector<8x128xf32>
    %c1_i32_51 = arith.constant 1 : i32
    %c0_i32_52 = arith.constant 0 : i32
    %c0_i32_53 = arith.constant 0 : i32
    %55 = tpu.memref_slice %arg11[%c1_i32_51, %c0_i32_52, %c0_i32_53] : memref<2x64x128xf32, #tpu.memory_space<vmem>> -> memref<1x64x128xf32, #tpu.memory_space<vmem>>
    %56 = tpu.memref_squeeze %55 : memref<1x64x128xf32, #tpu.memory_space<vmem>> -> memref<64x128xf32, #tpu.memory_space<vmem>>
    %c16_54 = arith.constant 16 : index
    %c0_55 = arith.constant 0 : index
    %57 = vector.load %56[%c16_54, %c0_55] : memref<64x128xf32, #tpu.memory_space<vmem>>, vector<8x128xf32>
    tpu.vector_store %56[%c16_54, %c0_55], %54 {strides = array<i32>} : memref<64x128xf32, #tpu.memory_space<vmem>>, vector<8x128xf32>,
    %c0_i32_56 = arith.constant 0 : i32
    %c0_i32_57 = arith.constant 0 : i32
    %c0_i32_58 = arith.constant 0 : i32
    %58 = tpu.memref_slice %arg11[%c0_i32_56, %c0_i32_57, %c0_i32_58] : memref<2x64x128xf32, #tpu.memory_space<vmem>> -> memref<1x64x128xf32, #tpu.memory_space<vmem>>
    %59 = tpu.memref_squeeze %58 : memref<1x64x128xf32, #tpu.memory_space<vmem>> -> memref<64x128xf32, #tpu.memory_space<vmem>>
    %c24 = arith.constant 24 : index
    %c0_59 = arith.constant 0 : index
    %60 = vector.load %59[%c24, %c0_59] : memref<64x128xf32, #tpu.memory_space<vmem>>, vector<8x128xf32>
    %cst_60 = arith.constant dense<0.000000e+00> : vector<8x128xf32>
    %61 = tpu.matmul %51, %12, %cst_60 {dimension_numbers = #tpu.dot_dimension_numbers<[1], [0], [0], [1], [0, 0, 1, 1], [], []>} : vector<8x128xf32>, vector<128x128xf32>, vector<8x128xf32> -> vector<8x128xf32>
    %62 = arith.addf %60, %61 : vector<8x128xf32>
    %cst_61 = arith.constant 0.000000e+00 : f32
    %63 = vector.broadcast %cst_61 : f32 to vector<8x128xf32>
    %64 = arith.maximumf %62, %63 : vector<8x128xf32>
    %cst_62 = arith.constant dense<0.000000e+00> : vector<8x128xf32>
    %65 = tpu.matmul %64, %14, %cst_62 {dimension_numbers = #tpu.dot_dimension_numbers<[1], [0], [0], [1], [0, 0, 1, 1], [], []>} : vector<8x128xf32>, vector<128x128xf32>, vector<8x128xf32> -> vector<8x128xf32>
    %66 = vector.broadcast %16 : vector<1x128xf32> to vector<8x128xf32>
    %67 = arith.addf %65, %66 : vector<8x128xf32>
    %c1_i32_63 = arith.constant 1 : i32
    %c0_i32_64 = arith.constant 0 : i32
    %c0_i32_65 = arith.constant 0 : i32
    %68 = tpu.memref_slice %arg11[%c1_i32_63, %c0_i32_64, %c0_i32_65] : memref<2x64x128xf32, #tpu.memory_space<vmem>> -> memref<1x64x128xf32, #tpu.memory_space<vmem>>
    %69 = tpu.memref_squeeze %68 : memref<1x64x128xf32, #tpu.memory_space<vmem>> -> memref<64x128xf32, #tpu.memory_space<vmem>>
    %c24_66 = arith.constant 24 : index
    %c0_67 = arith.constant 0 : index
    %70 = vector.load %69[%c24_66, %c0_67] : memref<64x128xf32, #tpu.memory_space<vmem>>, vector<8x128xf32>
    tpu.vector_store %69[%c24_66, %c0_67], %67 {strides = array<i32>} : memref<64x128xf32, #tpu.memory_space<vmem>>, vector<8x128xf32>,
    %c0_i32_68 = arith.constant 0 : i32
    %c0_i32_69 = arith.constant 0 : i32
    %c0_i32_70 = arith.constant 0 : i32
    %71 = tpu.memref_slice %arg11[%c0_i32_68, %c0_i32_69, %c0_i32_70] : memref<2x64x128xf32, #tpu.memory_space<vmem>> -> memref<1x64x128xf32, #tpu.memory_space<vmem>>
    %72 = tpu.memref_squeeze %71 : memref<1x64x128xf32, #tpu.memory_space<vmem>> -> memref<64x128xf32, #tpu.memory_space<vmem>>
    %c32 = arith.constant 32 : index
    %c0_71 = arith.constant 0 : index
    %73 = vector.load %72[%c32, %c0_71] : memref<64x128xf32, #tpu.memory_space<vmem>>, vector<8x128xf32>
    %cst_72 = arith.constant dense<0.000000e+00> : vector<8x128xf32>
    %74 = tpu.matmul %64, %12, %cst_72 {dimension_numbers = #tpu.dot_dimension_numbers<[1], [0], [0], [1], [0, 0, 1, 1], [], []>} : vector<8x128xf32>, vector<128x128xf32>, vector<8x128xf32> -> vector<8x128xf32>
    %75 = arith.addf %73, %74 : vector<8x128xf32>
    %cst_73 = arith.constant 0.000000e+00 : f32
    %76 = vector.broadcast %cst_73 : f32 to vector<8x128xf32>
    %77 = arith.maximumf %75, %76 : vector<8x128xf32>
    %cst_74 = arith.constant dense<0.000000e+00> : vector<8x128xf32>
    %78 = tpu.matmul %77, %14, %cst_74 {dimension_numbers = #tpu.dot_dimension_numbers<[1], [0], [0], [1], [0, 0, 1, 1], [], []>} : vector<8x128xf32>, vector<128x128xf32>, vector<8x128xf32> -> vector<8x128xf32>
    %79 = vector.broadcast %16 : vector<1x128xf32> to vector<8x128xf32>
    %80 = arith.addf %78, %79 : vector<8x128xf32>
    %c1_i32_75 = arith.constant 1 : i32
    %c0_i32_76 = arith.constant 0 : i32
    %c0_i32_77 = arith.constant 0 : i32
    %81 = tpu.memref_slice %arg11[%c1_i32_75, %c0_i32_76, %c0_i32_77] : memref<2x64x128xf32, #tpu.memory_space<vmem>> -> memref<1x64x128xf32, #tpu.memory_space<vmem>>
    %82 = tpu.memref_squeeze %81 : memref<1x64x128xf32, #tpu.memory_space<vmem>> -> memref<64x128xf32, #tpu.memory_space<vmem>>
    %c32_78 = arith.constant 32 : index
    %c0_79 = arith.constant 0 : index
    %83 = vector.load %82[%c32_78, %c0_79] : memref<64x128xf32, #tpu.memory_space<vmem>>, vector<8x128xf32>
    tpu.vector_store %82[%c32_78, %c0_79], %80 {strides = array<i32>} : memref<64x128xf32, #tpu.memory_space<vmem>>, vector<8x128xf32>,
    %c0_i32_80 = arith.constant 0 : i32
    %c0_i32_81 = arith.constant 0 : i32
    %c0_i32_82 = arith.constant 0 : i32
    %84 = tpu.memref_slice %arg11[%c0_i32_80, %c0_i32_81, %c0_i32_82] : memref<2x64x128xf32, #tpu.memory_space<vmem>> -> memref<1x64x128xf32, #tpu.memory_space<vmem>>
    %85 = tpu.memref_squeeze %84 : memref<1x64x128xf32, #tpu.memory_space<vmem>> -> memref<64x128xf32, #tpu.memory_space<vmem>>
    %c40 = arith.constant 40 : index
    %c0_83 = arith.constant 0 : index
    %86 = vector.load %85[%c40, %c0_83] : memref<64x128xf32, #tpu.memory_space<vmem>>, vector<8x128xf32>
    %cst_84 = arith.constant dense<0.000000e+00> : vector<8x128xf32>
    %87 = tpu.matmul %77, %12, %cst_84 {dimension_numbers = #tpu.dot_dimension_numbers<[1], [0], [0], [1], [0, 0, 1, 1], [], []>} : vector<8x128xf32>, vector<128x128xf32>, vector<8x128xf32> -> vector<8x128xf32>
    %88 = arith.addf %86, %87 : vector<8x128xf32>
    %cst_85 = arith.constant 0.000000e+00 : f32
    %89 = vector.broadcast %cst_85 : f32 to vector<8x128xf32>
    %90 = arith.maximumf %88, %89 : vector<8x128xf32>
    %cst_86 = arith.constant dense<0.000000e+00> : vector<8x128xf32>
    %91 = tpu.matmul %90, %14, %cst_86 {dimension_numbers = #tpu.dot_dimension_numbers<[1], [0], [0], [1], [0, 0, 1, 1], [], []>} : vector<8x128xf32>, vector<128x128xf32>, vector<8x128xf32> -> vector<8x128xf32>
    %92 = vector.broadcast %16 : vector<1x128xf32> to vector<8x128xf32>
    %93 = arith.addf %91, %92 : vector<8x128xf32>
    %c1_i32_87 = arith.constant 1 : i32
    %c0_i32_88 = arith.constant 0 : i32
    %c0_i32_89 = arith.constant 0 : i32
    %94 = tpu.memref_slice %arg11[%c1_i32_87, %c0_i32_88, %c0_i32_89] : memref<2x64x128xf32, #tpu.memory_space<vmem>> -> memref<1x64x128xf32, #tpu.memory_space<vmem>>
    %95 = tpu.memref_squeeze %94 : memref<1x64x128xf32, #tpu.memory_space<vmem>> -> memref<64x128xf32, #tpu.memory_space<vmem>>
    %c40_90 = arith.constant 40 : index
    %c0_91 = arith.constant 0 : index
    %96 = vector.load %95[%c40_90, %c0_91] : memref<64x128xf32, #tpu.memory_space<vmem>>, vector<8x128xf32>
    tpu.vector_store %95[%c40_90, %c0_91], %93 {strides = array<i32>} : memref<64x128xf32, #tpu.memory_space<vmem>>, vector<8x128xf32>,
    %c0_i32_92 = arith.constant 0 : i32
    %c0_i32_93 = arith.constant 0 : i32
    %c0_i32_94 = arith.constant 0 : i32
    %97 = tpu.memref_slice %arg11[%c0_i32_92, %c0_i32_93, %c0_i32_94] : memref<2x64x128xf32, #tpu.memory_space<vmem>> -> memref<1x64x128xf32, #tpu.memory_space<vmem>>
    %98 = tpu.memref_squeeze %97 : memref<1x64x128xf32, #tpu.memory_space<vmem>> -> memref<64x128xf32, #tpu.memory_space<vmem>>
    %c48 = arith.constant 48 : index
    %c0_95 = arith.constant 0 : index
    %99 = vector.load %98[%c48, %c0_95] : memref<64x128xf32, #tpu.memory_space<vmem>>, vector<8x128xf32>
    %cst_96 = arith.constant dense<0.000000e+00> : vector<8x128xf32>
    %100 = tpu.matmul %90, %12, %cst_96 {dimension_numbers = #tpu.dot_dimension_numbers<[1], [0], [0], [1], [0, 0, 1, 1], [], []>} : vector<8x128xf32>, vector<128x128xf32>, vector<8x128xf32> -> vector<8x128xf32>
    %101 = arith.addf %99, %100 : vector<8x128xf32>
    %cst_97 = arith.constant 0.000000e+00 : f32
    %102 = vector.broadcast %cst_97 : f32 to vector<8x128xf32>
    %103 = arith.maximumf %101, %102 : vector<8x128xf32>
    %cst_98 = arith.constant dense<0.000000e+00> : vector<8x128xf32>
    %104 = tpu.matmul %103, %14, %cst_98 {dimension_numbers = #tpu.dot_dimension_numbers<[1], [0], [0], [1], [0, 0, 1, 1], [], []>} : vector<8x128xf32>, vector<128x128xf32>, vector<8x128xf32> -> vector<8x128xf32>
    %105 = vector.broadcast %16 : vector<1x128xf32> to vector<8x128xf32>
    %106 = arith.addf %104, %105 : vector<8x128xf32>
    %c1_i32_99 = arith.constant 1 : i32
    %c0_i32_100 = arith.constant 0 : i32
    %c0_i32_101 = arith.constant 0 : i32
    %107 = tpu.memref_slice %arg11[%c1_i32_99, %c0_i32_100, %c0_i32_101] : memref<2x64x128xf32, #tpu.memory_space<vmem>> -> memref<1x64x128xf32, #tpu.memory_space<vmem>>
    %108 = tpu.memref_squeeze %107 : memref<1x64x128xf32, #tpu.memory_space<vmem>> -> memref<64x128xf32, #tpu.memory_space<vmem>>
    %c48_102 = arith.constant 48 : index
    %c0_103 = arith.constant 0 : index
    %109 = vector.load %108[%c48_102, %c0_103] : memref<64x128xf32, #tpu.memory_space<vmem>>, vector<8x128xf32>
    tpu.vector_store %108[%c48_102, %c0_103], %106 {strides = array<i32>} : memref<64x128xf32, #tpu.memory_space<vmem>>, vector<8x128xf32>,
    %c0_i32_104 = arith.constant 0 : i32
    %c0_i32_105 = arith.constant 0 : i32
    %c0_i32_106 = arith.constant 0 : i32
    %110 = tpu.memref_slice %arg11[%c0_i32_104, %c0_i32_105, %c0_i32_106] : memref<2x64x128xf32, #tpu.memory_space<vmem>> -> memref<1x64x128xf32, #tpu.memory_space<vmem>>
    %111 = tpu.memref_squeeze %110 : memref<1x64x128xf32, #tpu.memory_space<vmem>> -> memref<64x128xf32, #tpu.memory_space<vmem>>
    %c56 = arith.constant 56 : index
    %c0_107 = arith.constant 0 : index
    %112 = vector.load %111[%c56, %c0_107] : memref<64x128xf32, #tpu.memory_space<vmem>>, vector<8x128xf32>
    %cst_108 = arith.constant dense<0.000000e+00> : vector<8x128xf32>
    %113 = tpu.matmul %103, %12, %cst_108 {dimension_numbers = #tpu.dot_dimension_numbers<[1], [0], [0], [1], [0, 0, 1, 1], [], []>} : vector<8x128xf32>, vector<128x128xf32>, vector<8x128xf32> -> vector<8x128xf32>
    %114 = arith.addf %112, %113 : vector<8x128xf32>
    %cst_109 = arith.constant 0.000000e+00 : f32
    %115 = vector.broadcast %cst_109 : f32 to vector<8x128xf32>
    %116 = arith.maximumf %114, %115 : vector<8x128xf32>
    %cst_110 = arith.constant dense<0.000000e+00> : vector<8x128xf32>
    %117 = tpu.matmul %116, %14, %cst_110 {dimension_numbers = #tpu.dot_dimension_numbers<[1], [0], [0], [1], [0, 0, 1, 1], [], []>} : vector<8x128xf32>, vector<128x128xf32>, vector<8x128xf32> -> vector<8x128xf32>
    %118 = vector.broadcast %16 : vector<1x128xf32> to vector<8x128xf32>
    %119 = arith.addf %117, %118 : vector<8x128xf32>
    %c1_i32_111 = arith.constant 1 : i32
    %c0_i32_112 = arith.constant 0 : i32
    %c0_i32_113 = arith.constant 0 : i32
    %120 = tpu.memref_slice %arg11[%c1_i32_111, %c0_i32_112, %c0_i32_113] : memref<2x64x128xf32, #tpu.memory_space<vmem>> -> memref<1x64x128xf32, #tpu.memory_space<vmem>>
    %121 = tpu.memref_squeeze %120 : memref<1x64x128xf32, #tpu.memory_space<vmem>> -> memref<64x128xf32, #tpu.memory_space<vmem>>
    %c56_114 = arith.constant 56 : index
    %c0_115 = arith.constant 0 : index
    %122 = vector.load %121[%c56_114, %c0_115] : memref<64x128xf32, #tpu.memory_space<vmem>>, vector<8x128xf32>
    tpu.vector_store %121[%c56_114, %c0_115], %119 {strides = array<i32>} : memref<64x128xf32, #tpu.memory_space<vmem>>, vector<8x128xf32>,
    %c0_116 = arith.constant 0 : index
    %c0_117 = arith.constant 0 : index
    %c0_118 = arith.constant 0 : index
    %123 = vector.load %arg10[%c0_116, %c0_117, %c0_118] : memref<2x8x128xf32, #tpu.memory_space<vmem>>, vector<1x8x128xf32>
    %124 = vector.shape_cast %123 : vector<1x8x128xf32> to vector<8x128xf32>
    %125 = vector.shape_cast %116 : vector<8x128xf32> to vector<1x8x128xf32>
    tpu.vector_store %arg10[%c0_116, %c0_117, %c0_118], %125 {strides = array<i32>} : memref<2x8x128xf32, #tpu.memory_space<vmem>>, vector<1x8x128xf32>,
    %c1_119 = arith.constant 1 : index
    %c0_120 = arith.constant 0 : index
    %c0_121 = arith.constant 0 : index
    %126 = vector.load %arg4[%c1_119, %c0_120, %c0_121] : memref<2x128x128xf32, #tpu.memory_space<vmem>>, vector<1x128x128xf32>
    %127 = vector.shape_cast %126 : vector<1x128x128xf32> to vector<128x128xf32>
    %c0_122 = arith.constant 0 : index
    %c0_123 = arith.constant 0 : index
    %128 = vector.load %arg7[%c0_122, %c0_123] : memref<128x128xf32, #tpu.memory_space<vmem>>, vector<128x128xf32>
    %c0_124 = arith.constant 0 : index
    %c0_125 = arith.constant 0 : index
    %129 = vector.load %arg8[%c0_124, %c0_125] : memref<1x128xf32, #tpu.memory_space<vmem>>, vector<1x128xf32>
    %c1_126 = arith.constant 1 : index
    %c0_127 = arith.constant 0 : index
    %c0_128 = arith.constant 0 : index
    %130 = vector.load %arg6[%c1_126, %c0_127, %c0_128] : memref<2x8x128xf32, #tpu.memory_space<vmem>>, vector<1x8x128xf32>
    %131 = vector.shape_cast %130 : vector<1x8x128xf32> to vector<8x128xf32>
    %c1_i32_129 = arith.constant 1 : i32
    %c0_i32_130 = arith.constant 0 : i32
    %c0_i32_131 = arith.constant 0 : i32
    %132 = tpu.memref_slice %arg11[%c1_i32_129, %c0_i32_130, %c0_i32_131] : memref<2x64x128xf32, #tpu.memory_space<vmem>> -> memref<1x64x128xf32, #tpu.memory_space<vmem>>
    %133 = tpu.memref_squeeze %132 : memref<1x64x128xf32, #tpu.memory_space<vmem>> -> memref<64x128xf32, #tpu.memory_space<vmem>>
    %c0_132 = arith.constant 0 : index
    %c0_133 = arith.constant 0 : index
    %134 = vector.load %133[%c0_132, %c0_133] : memref<64x128xf32, #tpu.memory_space<vmem>>, vector<8x128xf32>
    %cst_134 = arith.constant dense<0.000000e+00> : vector<8x128xf32>
    %135 = tpu.matmul %131, %127, %cst_134 {dimension_numbers = #tpu.dot_dimension_numbers<[1], [0], [0], [1], [0, 0, 1, 1], [], []>} : vector<8x128xf32>, vector<128x128xf32>, vector<8x128xf32> -> vector<8x128xf32>
    %136 = arith.addf %134, %135 : vector<8x128xf32>
    %cst_135 = arith.constant 0.000000e+00 : f32
    %137 = vector.broadcast %cst_135 : f32 to vector<8x128xf32>
    %138 = arith.maximumf %136, %137 : vector<8x128xf32>
    %cst_136 = arith.constant dense<0.000000e+00> : vector<8x128xf32>
    %139 = tpu.matmul %138, %128, %cst_136 {dimension_numbers = #tpu.dot_dimension_numbers<[1], [0], [0], [1], [0, 0, 1, 1], [], []>} : vector<8x128xf32>, vector<128x128xf32>, vector<8x128xf32> -> vector<8x128xf32>
    %140 = vector.broadcast %129 : vector<1x128xf32> to vector<8x128xf32>
    %141 = arith.addf %139, %140 : vector<8x128xf32>
    %c0_137 = arith.constant 0 : index
    %c0_138 = arith.constant 0 : index
    %142 = vector.load %arg9[%c0_137, %c0_138] : memref<64x128xf32, #tpu.memory_space<vmem>>, vector<8x128xf32>
    tpu.vector_store %arg9[%c0_137, %c0_138], %141 {strides = array<i32>} : memref<64x128xf32, #tpu.memory_space<vmem>>, vector<8x128xf32>,
    %c1_i32_139 = arith.constant 1 : i32
    %c0_i32_140 = arith.constant 0 : i32
    %c0_i32_141 = arith.constant 0 : i32
    %143 = tpu.memref_slice %arg11[%c1_i32_139, %c0_i32_140, %c0_i32_141] : memref<2x64x128xf32, #tpu.memory_space<vmem>> -> memref<1x64x128xf32, #tpu.memory_space<vmem>>
    %144 = tpu.memref_squeeze %143 : memref<1x64x128xf32, #tpu.memory_space<vmem>> -> memref<64x128xf32, #tpu.memory_space<vmem>>
    %c8_142 = arith.constant 8 : index
    %c0_143 = arith.constant 0 : index
    %145 = vector.load %144[%c8_142, %c0_143] : memref<64x128xf32, #tpu.memory_space<vmem>>, vector<8x128xf32>
    %cst_144 = arith.constant dense<0.000000e+00> : vector<8x128xf32>
    %146 = tpu.matmul %138, %127, %cst_144 {dimension_numbers = #tpu.dot_dimension_numbers<[1], [0], [0], [1], [0, 0, 1, 1], [], []>} : vector<8x128xf32>, vector<128x128xf32>, vector<8x128xf32> -> vector<8x128xf32>
    %147 = arith.addf %145, %146 : vector<8x128xf32>
    %cst_145 = arith.constant 0.000000e+00 : f32
    %148 = vector.broadcast %cst_145 : f32 to vector<8x128xf32>
    %149 = arith.maximumf %147, %148 : vector<8x128xf32>
    %cst_146 = arith.constant dense<0.000000e+00> : vector<8x128xf32>
    %150 = tpu.matmul %149, %128, %cst_146 {dimension_numbers = #tpu.dot_dimension_numbers<[1], [0], [0], [1], [0, 0, 1, 1], [], []>} : vector<8x128xf32>, vector<128x128xf32>, vector<8x128xf32> -> vector<8x128xf32>
    %151 = vector.broadcast %129 : vector<1x128xf32> to vector<8x128xf32>
    %152 = arith.addf %150, %151 : vector<8x128xf32>
    %c8_147 = arith.constant 8 : index
    %c0_148 = arith.constant 0 : index
    %153 = vector.load %arg9[%c8_147, %c0_148] : memref<64x128xf32, #tpu.memory_space<vmem>>, vector<8x128xf32>
    tpu.vector_store %arg9[%c8_147, %c0_148], %152 {strides = array<i32>} : memref<64x128xf32, #tpu.memory_space<vmem>>, vector<8x128xf32>,
    %c1_i32_149 = arith.constant 1 : i32
    %c0_i32_150 = arith.constant 0 : i32
    %c0_i32_151 = arith.constant 0 : i32
    %154 = tpu.memref_slice %arg11[%c1_i32_149, %c0_i32_150, %c0_i32_151] : memref<2x64x128xf32, #tpu.memory_space<vmem>> -> memref<1x64x128xf32, #tpu.memory_space<vmem>>
    %155 = tpu.memref_squeeze %154 : memref<1x64x128xf32, #tpu.memory_space<vmem>> -> memref<64x128xf32, #tpu.memory_space<vmem>>
    %c16_152 = arith.constant 16 : index
    %c0_153 = arith.constant 0 : index
    %156 = vector.load %155[%c16_152, %c0_153] : memref<64x128xf32, #tpu.memory_space<vmem>>, vector<8x128xf32>
    %cst_154 = arith.constant dense<0.000000e+00> : vector<8x128xf32>
    %157 = tpu.matmul %149, %127, %cst_154 {dimension_numbers = #tpu.dot_dimension_numbers<[1], [0], [0], [1], [0, 0, 1, 1], [], []>} : vector<8x128xf32>, vector<128x128xf32>, vector<8x128xf32> -> vector<8x128xf32>
    %158 = arith.addf %156, %157 : vector<8x128xf32>
    %cst_155 = arith.constant 0.000000e+00 : f32
    %159 = vector.broadcast %cst_155 : f32 to vector<8x128xf32>
    %160 = arith.maximumf %158, %159 : vector<8x128xf32>
    %cst_156 = arith.constant dense<0.000000e+00> : vector<8x128xf32>
    %161 = tpu.matmul %160, %128, %cst_156 {dimension_numbers = #tpu.dot_dimension_numbers<[1], [0], [0], [1], [0, 0, 1, 1], [], []>} : vector<8x128xf32>, vector<128x128xf32>, vector<8x128xf32> -> vector<8x128xf32>
    %162 = vector.broadcast %129 : vector<1x128xf32> to vector<8x128xf32>
    %163 = arith.addf %161, %162 : vector<8x128xf32>
    %c16_157 = arith.constant 16 : index
    %c0_158 = arith.constant 0 : index
    %164 = vector.load %arg9[%c16_157, %c0_158] : memref<64x128xf32, #tpu.memory_space<vmem>>, vector<8x128xf32>
    tpu.vector_store %arg9[%c16_157, %c0_158], %163 {strides = array<i32>} : memref<64x128xf32, #tpu.memory_space<vmem>>, vector<8x128xf32>,
    %c1_i32_159 = arith.constant 1 : i32
    %c0_i32_160 = arith.constant 0 : i32
    %c0_i32_161 = arith.constant 0 : i32
    %165 = tpu.memref_slice %arg11[%c1_i32_159, %c0_i32_160, %c0_i32_161] : memref<2x64x128xf32, #tpu.memory_space<vmem>> -> memref<1x64x128xf32, #tpu.memory_space<vmem>>
    %166 = tpu.memref_squeeze %165 : memref<1x64x128xf32, #tpu.memory_space<vmem>> -> memref<64x128xf32, #tpu.memory_space<vmem>>
    %c24_162 = arith.constant 24 : index
    %c0_163 = arith.constant 0 : index
    %167 = vector.load %166[%c24_162, %c0_163] : memref<64x128xf32, #tpu.memory_space<vmem>>, vector<8x128xf32>
    %cst_164 = arith.constant dense<0.000000e+00> : vector<8x128xf32>
    %168 = tpu.matmul %160, %127, %cst_164 {dimension_numbers = #tpu.dot_dimension_numbers<[1], [0], [0], [1], [0, 0, 1, 1], [], []>} : vector<8x128xf32>, vector<128x128xf32>, vector<8x128xf32> -> vector<8x128xf32>
    %169 = arith.addf %167, %168 : vector<8x128xf32>
    %cst_165 = arith.constant 0.000000e+00 : f32
    %170 = vector.broadcast %cst_165 : f32 to vector<8x128xf32>
    %171 = arith.maximumf %169, %170 : vector<8x128xf32>
    %cst_166 = arith.constant dense<0.000000e+00> : vector<8x128xf32>
    %172 = tpu.matmul %171, %128, %cst_166 {dimension_numbers = #tpu.dot_dimension_numbers<[1], [0], [0], [1], [0, 0, 1, 1], [], []>} : vector<8x128xf32>, vector<128x128xf32>, vector<8x128xf32> -> vector<8x128xf32>
    %173 = vector.broadcast %129 : vector<1x128xf32> to vector<8x128xf32>
    %174 = arith.addf %172, %173 : vector<8x128xf32>
    %c24_167 = arith.constant 24 : index
    %c0_168 = arith.constant 0 : index
    %175 = vector.load %arg9[%c24_167, %c0_168] : memref<64x128xf32, #tpu.memory_space<vmem>>, vector<8x128xf32>
    tpu.vector_store %arg9[%c24_167, %c0_168], %174 {strides = array<i32>} : memref<64x128xf32, #tpu.memory_space<vmem>>, vector<8x128xf32>,
    %c1_i32_169 = arith.constant 1 : i32
    %c0_i32_170 = arith.constant 0 : i32
    %c0_i32_171 = arith.constant 0 : i32
    %176 = tpu.memref_slice %arg11[%c1_i32_169, %c0_i32_170, %c0_i32_171] : memref<2x64x128xf32, #tpu.memory_space<vmem>> -> memref<1x64x128xf32, #tpu.memory_space<vmem>>
    %177 = tpu.memref_squeeze %176 : memref<1x64x128xf32, #tpu.memory_space<vmem>> -> memref<64x128xf32, #tpu.memory_space<vmem>>
    %c32_172 = arith.constant 32 : index
    %c0_173 = arith.constant 0 : index
    %178 = vector.load %177[%c32_172, %c0_173] : memref<64x128xf32, #tpu.memory_space<vmem>>, vector<8x128xf32>
    %cst_174 = arith.constant dense<0.000000e+00> : vector<8x128xf32>
    %179 = tpu.matmul %171, %127, %cst_174 {dimension_numbers = #tpu.dot_dimension_numbers<[1], [0], [0], [1], [0, 0, 1, 1], [], []>} : vector<8x128xf32>, vector<128x128xf32>, vector<8x128xf32> -> vector<8x128xf32>
    %180 = arith.addf %178, %179 : vector<8x128xf32>
    %cst_175 = arith.constant 0.000000e+00 : f32
    %181 = vector.broadcast %cst_175 : f32 to vector<8x128xf32>
    %182 = arith.maximumf %180, %181 : vector<8x128xf32>
    %cst_176 = arith.constant dense<0.000000e+00> : vector<8x128xf32>
    %183 = tpu.matmul %182, %128, %cst_176 {dimension_numbers = #tpu.dot_dimension_numbers<[1], [0], [0], [1], [0, 0, 1, 1], [], []>} : vector<8x128xf32>, vector<128x128xf32>, vector<8x128xf32> -> vector<8x128xf32>
    %184 = vector.broadcast %129 : vector<1x128xf32> to vector<8x128xf32>
    %185 = arith.addf %183, %184 : vector<8x128xf32>
    %c32_177 = arith.constant 32 : index
    %c0_178 = arith.constant 0 : index
    %186 = vector.load %arg9[%c32_177, %c0_178] : memref<64x128xf32, #tpu.memory_space<vmem>>, vector<8x128xf32>
    tpu.vector_store %arg9[%c32_177, %c0_178], %185 {strides = array<i32>} : memref<64x128xf32, #tpu.memory_space<vmem>>, vector<8x128xf32>,
    %c1_i32_179 = arith.constant 1 : i32
    %c0_i32_180 = arith.constant 0 : i32
    %c0_i32_181 = arith.constant 0 : i32
    %187 = tpu.memref_slice %arg11[%c1_i32_179, %c0_i32_180, %c0_i32_181] : memref<2x64x128xf32, #tpu.memory_space<vmem>> -> memref<1x64x128xf32, #tpu.memory_space<vmem>>
    %188 = tpu.memref_squeeze %187 : memref<1x64x128xf32, #tpu.memory_space<vmem>> -> memref<64x128xf32, #tpu.memory_space<vmem>>
    %c40_182 = arith.constant 40 : index
    %c0_183 = arith.constant 0 : index
    %189 = vector.load %188[%c40_182, %c0_183] : memref<64x128xf32, #tpu.memory_space<vmem>>, vector<8x128xf32>
    %cst_184 = arith.constant dense<0.000000e+00> : vector<8x128xf32>
    %190 = tpu.matmul %182, %127, %cst_184 {dimension_numbers = #tpu.dot_dimension_numbers<[1], [0], [0], [1], [0, 0, 1, 1], [], []>} : vector<8x128xf32>, vector<128x128xf32>, vector<8x128xf32> -> vector<8x128xf32>
    %191 = arith.addf %189, %190 : vector<8x128xf32>
    %cst_185 = arith.constant 0.000000e+00 : f32
    %192 = vector.broadcast %cst_185 : f32 to vector<8x128xf32>
    %193 = arith.maximumf %191, %192 : vector<8x128xf32>
    %cst_186 = arith.constant dense<0.000000e+00> : vector<8x128xf32>
    %194 = tpu.matmul %193, %128, %cst_186 {dimension_numbers = #tpu.dot_dimension_numbers<[1], [0], [0], [1], [0, 0, 1, 1], [], []>} : vector<8x128xf32>, vector<128x128xf32>, vector<8x128xf32> -> vector<8x128xf32>
    %195 = vector.broadcast %129 : vector<1x128xf32> to vector<8x128xf32>
    %196 = arith.addf %194, %195 : vector<8x128xf32>
    %c40_187 = arith.constant 40 : index
    %c0_188 = arith.constant 0 : index
    %197 = vector.load %arg9[%c40_187, %c0_188] : memref<64x128xf32, #tpu.memory_space<vmem>>, vector<8x128xf32>
    tpu.vector_store %arg9[%c40_187, %c0_188], %196 {strides = array<i32>} : memref<64x128xf32, #tpu.memory_space<vmem>>, vector<8x128xf32>,
    %c1_i32_189 = arith.constant 1 : i32
    %c0_i32_190 = arith.constant 0 : i32
    %c0_i32_191 = arith.constant 0 : i32
    %198 = tpu.memref_slice %arg11[%c1_i32_189, %c0_i32_190, %c0_i32_191] : memref<2x64x128xf32, #tpu.memory_space<vmem>> -> memref<1x64x128xf32, #tpu.memory_space<vmem>>
    %199 = tpu.memref_squeeze %198 : memref<1x64x128xf32, #tpu.memory_space<vmem>> -> memref<64x128xf32, #tpu.memory_space<vmem>>
    %c48_192 = arith.constant 48 : index
    %c0_193 = arith.constant 0 : index
    %200 = vector.load %199[%c48_192, %c0_193] : memref<64x128xf32, #tpu.memory_space<vmem>>, vector<8x128xf32>
    %cst_194 = arith.constant dense<0.000000e+00> : vector<8x128xf32>
    %201 = tpu.matmul %193, %127, %cst_194 {dimension_numbers = #tpu.dot_dimension_numbers<[1], [0], [0], [1], [0, 0, 1, 1], [], []>} : vector<8x128xf32>, vector<128x128xf32>, vector<8x128xf32> -> vector<8x128xf32>
    %202 = arith.addf %200, %201 : vector<8x128xf32>
    %cst_195 = arith.constant 0.000000e+00 : f32
    %203 = vector.broadcast %cst_195 : f32 to vector<8x128xf32>
    %204 = arith.maximumf %202, %203 : vector<8x128xf32>
    %cst_196 = arith.constant dense<0.000000e+00> : vector<8x128xf32>
    %205 = tpu.matmul %204, %128, %cst_196 {dimension_numbers = #tpu.dot_dimension_numbers<[1], [0], [0], [1], [0, 0, 1, 1], [], []>} : vector<8x128xf32>, vector<128x128xf32>, vector<8x128xf32> -> vector<8x128xf32>
    %206 = vector.broadcast %129 : vector<1x128xf32> to vector<8x128xf32>
    %207 = arith.addf %205, %206 : vector<8x128xf32>
    %c48_197 = arith.constant 48 : index
    %c0_198 = arith.constant 0 : index
    %208 = vector.load %arg9[%c48_197, %c0_198] : memref<64x128xf32, #tpu.memory_space<vmem>>, vector<8x128xf32>
    tpu.vector_store %arg9[%c48_197, %c0_198], %207 {strides = array<i32>} : memref<64x128xf32, #tpu.memory_space<vmem>>, vector<8x128xf32>,
    %c1_i32_199 = arith.constant 1 : i32
    %c0_i32_200 = arith.constant 0 : i32
    %c0_i32_201 = arith.constant 0 : i32
    %209 = tpu.memref_slice %arg11[%c1_i32_199, %c0_i32_200, %c0_i32_201] : memref<2x64x128xf32, #tpu.memory_space<vmem>> -> memref<1x64x128xf32, #tpu.memory_space<vmem>>
    %210 = tpu.memref_squeeze %209 : memref<1x64x128xf32, #tpu.memory_space<vmem>> -> memref<64x128xf32, #tpu.memory_space<vmem>>
    %c56_202 = arith.constant 56 : index
    %c0_203 = arith.constant 0 : index
    %211 = vector.load %210[%c56_202, %c0_203] : memref<64x128xf32, #tpu.memory_space<vmem>>, vector<8x128xf32>
    %cst_204 = arith.constant dense<0.000000e+00> : vector<8x128xf32>
    %212 = tpu.matmul %204, %127, %cst_204 {dimension_numbers = #tpu.dot_dimension_numbers<[1], [0], [0], [1], [0, 0, 1, 1], [], []>} : vector<8x128xf32>, vector<128x128xf32>, vector<8x128xf32> -> vector<8x128xf32>
    %213 = arith.addf %211, %212 : vector<8x128xf32>
    %cst_205 = arith.constant 0.000000e+00 : f32
    %214 = vector.broadcast %cst_205 : f32 to vector<8x128xf32>
    %215 = arith.maximumf %213, %214 : vector<8x128xf32>
    %cst_206 = arith.constant dense<0.000000e+00> : vector<8x128xf32>
    %216 = tpu.matmul %215, %128, %cst_206 {dimension_numbers = #tpu.dot_dimension_numbers<[1], [0], [0], [1], [0, 0, 1, 1], [], []>} : vector<8x128xf32>, vector<128x128xf32>, vector<8x128xf32> -> vector<8x128xf32>
    %217 = vector.broadcast %129 : vector<1x128xf32> to vector<8x128xf32>
    %218 = arith.addf %216, %217 : vector<8x128xf32>
    %c56_207 = arith.constant 56 : index
    %c0_208 = arith.constant 0 : index
    %219 = vector.load %arg9[%c56_207, %c0_208] : memref<64x128xf32, #tpu.memory_space<vmem>>, vector<8x128xf32>
    tpu.vector_store %arg9[%c56_207, %c0_208], %218 {strides = array<i32>} : memref<64x128xf32, #tpu.memory_space<vmem>>, vector<8x128xf32>,
    %c1_209 = arith.constant 1 : index
    %c0_210 = arith.constant 0 : index
    %c0_211 = arith.constant 0 : index
    %220 = vector.load %arg10[%c1_209, %c0_210, %c0_211] : memref<2x8x128xf32, #tpu.memory_space<vmem>>, vector<1x8x128xf32>
    %221 = vector.shape_cast %220 : vector<1x8x128xf32> to vector<8x128xf32>
    %222 = vector.shape_cast %215 : vector<8x128xf32> to vector<1x8x128xf32>
    tpu.vector_store %arg10[%c1_209, %c0_210, %c0_211], %222 {strides = array<i32>} : memref<2x8x128xf32, #tpu.memory_space<vmem>>, vector<1x8x128xf32>,
    return
  }
  func.func @transform_0(%arg0: i32) -> (i32, i32, i32) {
    %c0_i32 = arith.constant 0 : i32
    %c0_i32_0 = arith.constant 0 : i32
    %c0_i32_1 = arith.constant 0 : i32
    %c0_i32_2 = arith.constant 0 : i32
    return %c0_i32, %c0_i32_0, %c0_i32_1 : i32, i32, i32
  }
  func.func @transform_1(%arg0: i32) -> (i32, i32) {
    %c0_i32 = arith.constant 0 : i32
    %c0_i32_0 = arith.constant 0 : i32
    %c0_i32_1 = arith.constant 0 : i32
    return %c0_i32, %c0_i32_0 : i32, i32
  }
  func.func @transform_2(%arg0: i32) -> (i32, i32, i32) {
    %c0_i32 = arith.constant 0 : i32
    %c0_i32_0 = arith.constant 0 : i32
    %c0_i32_1 = arith.constant 0 : i32
    %c0_i32_2 = arith.constant 0 : i32
    return %c0_i32, %c0_i32_0, %c0_i32_1 : i32, i32, i32
  }
  func.func @transform_3(%arg0: i32) -> (i32, i32, i32) {
    %c0_i32 = arith.constant 0 : i32
    %c0_i32_0 = arith.constant 0 : i32
    %c0_i32_1 = arith.constant 0 : i32
    %c0_i32_2 = arith.constant 0 : i32
    return %c0_i32, %c0_i32_0, %c0_i32_1 : i32, i32, i32
  }
  func.func @transform_4(%arg0: i32) -> (i32, i32, i32) {
    %c0_i32 = arith.constant 0 : i32
    %c0_i32_0 = arith.constant 0 : i32
    %c0_i32_1 = arith.constant 0 : i32
    %c0_i32_2 = arith.constant 0 : i32
    return %c0_i32, %c0_i32_0, %c0_i32_1 : i32, i32, i32
  }
  func.func @transform_5(%arg0: i32) -> (i32, i32, i32) {
    %c0_i32 = arith.constant 0 : i32
    %c0_i32_0 = arith.constant 0 : i32
    %c0_i32_1 = arith.constant 0 : i32
    %c0_i32_2 = arith.constant 0 : i32
    return %c0_i32, %c0_i32_0, %c0_i32_1 : i32, i32, i32
  }
  func.func @transform_6(%arg0: i32) -> (i32, i32) {
    %c0_i32 = arith.constant 0 : i32
    %c0_i32_0 = arith.constant 0 : i32
    %c0_i32_1 = arith.constant 0 : i32
    return %c0_i32, %c0_i32_0 : i32, i32
  }
  func.func @transform_7(%arg0: i32) -> (i32, i32) {
    %c0_i32 = arith.constant 0 : i32
    %c0_i32_0 = arith.constant 0 : i32
    %c0_i32_1 = arith.constant 0 : i32
    return %c0_i32, %c0_i32_0 : i32, i32
  }
  func.func @transform_8(%arg0: i32) -> (i32, i32) {
    %c0_i32 = arith.constant 0 : i32
    %c0_i32_0 = arith.constant 0 : i32
    %c0_i32_1 = arith.constant 0 : i32
    return %c0_i32, %c0_i32_0 : i32, i32
  }
  func.func @transform_9(%arg0: i32) -> (i32, i32, i32) {
    %c0_i32 = arith.constant 0 : i32
    %c0_i32_0 = arith.constant 0 : i32
    %c0_i32_1 = arith.constant 0 : i32
    %c0_i32_2 = arith.constant 0 : i32
    return %c0_i32, %c0_i32_0, %c0_i32_1 : i32, i32, i32
  }
}

</mosaic_0001>

<bundles_post_ra>
// kernel: darrnn_forward.1
= control target key start
LH: loop header
LB: loop body
LE: loop exit
PB: predicated region body
PF: predicated region fallthrough
CT: control target
= control target key end

     0   :  { %v4393_v2 = vmov 0.0   ;;  %vm4394_vm0 = vmmov 0   ;;  %s6186_s1 = inlined_call_operand.vmem [shape: f32[128,128], index: 1, kind: input, shape index: {}]   ;;  %s6187_s3 = inlined_call_operand.vmem [shape: f32[2,128,128], index: 3, kind: input, shape index: {}]   ;;  %s6188_s0 = inlined_call_operand.vmem [shape: f32[8,8,128], index: 0, kind: input, shape index: {}]   ;;  %s6189_s5 = inlined_call_operand.vmem [shape: f32[2,8,128], index: 5, kind: input, shape index: {}]   ;;  %s6190_s2 = inlined_call_operand.vmem [shape: f32[1,128,128], index: 2, kind: input, shape index: {}]   ;;  %s6191_s4 = inlined_call_operand.vmem [shape: f32[2,1,128], index: 4, kind: input, shape index: {}]   ;;  %s6192_s6 = inlined_call_operand.vmem [shape: f32[128,128], index: 6, kind: input, shape index: {}]   ;;  %s6193_s9 = inlined_call_operand.vmem [shape: f32[2,8,128], index: 9, kind: output, shape index: {1}]   ;;  %s6194_s7 = inlined_call_operand.vmem [shape: f32[1,128], index: 7, kind: input, shape index: {}]   ;;  %s6195_s8 = inlined_call_operand.vmem [shape: f32[64,128], index: 8, kind: output, shape index: {0}]  }
   0x1   :  { %v54_v0 = vld [vmem:[%s6186_s1 + $0x78] sm:$0xff]  ;;  %v53_v1 = vld [vmem:[%s6186_s1 + $0x70] sm:$0xff]  ;;  %3208 = vmatprep.subr.mxu1 %v4393_v2  ;;  %3240 = vmatprep.mubr.msk.f32.mxu1 %vm4394_vm0, %v4393_v2  ;;  %v52_v5 = vld [vmem:[%s6186_s1 + $0x68] sm:$0xff] }
   0x2   :  { %v4455_v3 = vld [vmem:[%s6187_s3 + $0x78] sm:$0xff]  ;;  %3164 = vmatprep.subr.mxu0 %v54_v0  ;;  %v4463_v4 = vld [vmem:[%s6187_s3 + $0x70] sm:$0xff]  ;;  %v4472_v6 = vld [vmem:[%s6187_s3 + $0x68] sm:$0xff] }
   0x3   :  { %3209 = vmatpush3.msra.mxu1 %v4455_v3  ;;  %3165 = vmatpush3.msra.mxu0 %v54_v0  ;;  %v51_v7 = vld [vmem:[%s6186_s1 + $0x60] sm:$0xff]  ;;  %v50_v9 = vld [vmem:[%s6186_s1 + $0x58] sm:$0xff]  ;;  %v49_v11 = vld [vmem:[%s6186_s1 + $0x50] sm:$0xff] }
   0x4   :  { %3210 = vmatprep.subr.mxu1 %v4393_v2  ;;  %3166 = vmatprep.subr.mxu0 %v53_v1  ;;  %v4482_v8 = vld [vmem:[%s6187_s3 + $0x60] sm:$0xff]  ;;  %v4492_v10 = vld [vmem:[%s6187_s3 + $0x58] sm:$0xff]  ;;  %v4502_v12 = vld [vmem:[%s6187_s3 + $0x50] sm:$0xff] }
   0x5   :  { %3211 = vmatpush3.msra.mxu1 %v4463_v4  ;;  %3167 = vmatpush3.msra.mxu0 %v53_v1  ;;  %v48_v13 = vld [vmem:[%s6186_s1 + $0x48] sm:$0xff]  ;;  %v47_v15 = vld [vmem:[%s6186_s1 + $0x40] sm:$0xff]  ;;  %v46_v17 = vld [vmem:[%s6186_s1 + $0x38] sm:$0xff] }
   0x6   :  { %3212 = vmatprep.subr.mxu1 %v4393_v2  ;;  %3168 = vmatprep.subr.mxu0 %v52_v5  ;;  %v4512_v14 = vld [vmem:[%s6187_s3 + $0x48] sm:$0xff]  ;;  %v4522_v16 = vld [vmem:[%s6187_s3 + $0x40] sm:$0xff]  ;;  %v4532_v18 = vld [vmem:[%s6187_s3 + $0x38] sm:$0xff] }
   0x7   :  { %3213 = vmatpush3.msra.mxu1 %v4472_v6  ;;  %3169 = vmatpush3.msra.mxu0 %v52_v5  ;;  %v45_v19 = vld [vmem:[%s6186_s1 + $0x30] sm:$0xff]  ;;  %v44_v21 = vld [vmem:[%s6186_s1 + $0x28] sm:$0xff]  ;;  %v43_v23 = vld [vmem:[%s6186_s1 + $0x20] sm:$0xff] }
   0x8   :  { %3214 = vmatprep.subr.mxu1 %v4393_v2  ;;  %3170 = vmatprep.subr.mxu0 %v51_v7  ;;  %v4542_v20 = vld [vmem:[%s6187_s3 + $0x30] sm:$0xff]  ;;  %v4552_v22 = vld [vmem:[%s6187_s3 + $0x28] sm:$0xff]  ;;  %v4562_v24 = vld [vmem:[%s6187_s3 + $0x20] sm:$0xff] }
   0x9   :  { %3215 = vmatpush3.msra.mxu1 %v4482_v8  ;;  %3171 = vmatpush3.msra.mxu0 %v51_v7  ;;  %v42_v25 = vld [vmem:[%s6186_s1 + $0x18] sm:$0xff]  ;;  %v41_v27 = vld [vmem:[%s6186_s1 + $0x10] sm:$0xff]  ;;  %v40_v29 = vld [vmem:[%s6186_s1 + $0x8] sm:$0xff] }
   0xa   :  { %3216 = vmatprep.subr.mxu1 %v4393_v2  ;;  %3172 = vmatprep.subr.mxu0 %v50_v9  ;;  %v4572_v26 = vld [vmem:[%s6187_s3 + $0x18] sm:$0xff]  ;;  %v4582_v28 = vld [vmem:[%s6187_s3 + $0x10] sm:$0xff]  ;;  %v31_v30 = vld [vmem:[%s6188_s0] sm:$0xff] }
   0xb   :  { %3217 = vmatpush3.msra.mxu1 %v4492_v10  ;;  %3173 = vmatpush3.msra.mxu0 %v50_v9  ;;  %v4596_v31 = vld [vmem:[%s6187_s3 + $0x8] sm:$0xff]  ;;  %v39_v32 = vld [vmem:[%s6186_s1] sm:$0xff]  ;;  %v4619_v36 = vld [vmem:[%s6190_s2 + $0x78] sm:$0xff] }
   0xc   :  { %3218 = vmatprep.subr.mxu1 %v4393_v2  ;;  %3174 = vmatprep.subr.mxu0 %v49_v11  ;;  %v4605_v33 = vld [vmem:[%s6187_s3] sm:$0xff]  ;;  %v32_v34 = vld [vmem:[%s6188_s0 + $0x8] sm:$0xff]  ;;  %v4626_v37 = vld [vmem:[%s6190_s2 + $0x70] sm:$0xff] }
   0xd   :  { %3219 = vmatpush3.msra.mxu1 %v4502_v12  ;;  %3175 = vmatpush3.msra.mxu0 %v49_v11  ;;  %v209_v35 = vld [vmem:[%s6189_s5] sm:$0xff]  ;;  %v4635_v38 = vld [vmem:[%s6190_s2 + $0x68] sm:$0xff]  ;;  %v4653_v40 = vld [vmem:[%s6190_s2 + $0x58] sm:$0xff] }
   0xe   :  { %3220 = vmatprep.subr.mxu1 %v4393_v2  ;;  %3176 = vmatprep.subr.mxu0 %v48_v13  ;;  %v4644_v39 = vld [vmem:[%s6190_s2 + $0x60] sm:$0xff]  ;;  %v4662_v41 = vld [vmem:[%s6190_s2 + $0x50] sm:$0xff]  ;;  %v4671_v42 = vld [vmem:[%s6190_s2 + $0x48] sm:$0xff] }
   0xf   :  { %3221 = vmatpush3.msra.mxu1 %v4512_v14  ;;  %3177 = vmatpush3.msra.mxu0 %v48_v13  ;;  %v4680_v43 = vld [vmem:[%s6190_s2 + $0x40] sm:$0xff]  ;;  %v4689_v44 = vld [vmem:[%s6190_s2 + $0x38] sm:$0xff]  ;;  %v33_v45 = vld [vmem:[%s6188_s0 + $0x10] sm:$0xff] }
  0x10   :  { %3222 = vmatprep.subr.mxu1 %v4393_v2  ;;  %3178 = vmatprep.subr.mxu0 %v47_v15  ;;  %v4701_v46 = vld [vmem:[%s6190_s2 + $0x30] sm:$0xff]  ;;  %v34_v47 = vld [vmem:[%s6188_s0 + $0x18] sm:$0xff]  ;;  %v4714_v48 = vld [vmem:[%s6190_s2 + $0x28] sm:$0xff] }
  0x11   :  { %3223 = vmatpush3.msra.mxu1 %v4522_v16  ;;  %3179 = vmatpush3.msra.mxu0 %v47_v15  ;;  %v35_v49 = vld [vmem:[%s6188_s0 + $0x20] sm:$0xff]  ;;  %v36_v51 = vld [vmem:[%s6188_s0 + $0x28] sm:$0xff]  ;;  %v4751_v52 = vld [vmem:[%s6190_s2 + $0x18] sm:$0xff] }
  0x12   :  { %3224 = vmatprep.subr.mxu1 %v4393_v2  ;;  %3180 = vmatprep.subr.mxu0 %v46_v17  ;;  %v4741_v50 = vld [vmem:[%s6190_s2 + $0x20] sm:$0xff]  ;;  %v37_v53 = vld [vmem:[%s6188_s0 + $0x30] sm:$0xff]  ;;  %v38_v55 = vld [vmem:[%s6188_s0 + $0x38] sm:$0xff] }
  0x13   :  { %3225 = vmatpush3.msra.mxu1 %v4532_v18  ;;  %3181 = vmatpush3.msra.mxu0 %v46_v17  ;;  %v4761_v54 = vld [vmem:[%s6190_s2 + $0x10] sm:$0xff]  ;;  %v4771_v56 = vld [vmem:[%s6190_s2 + $0x8] sm:$0xff]  ;;  %v4780_v57 = vld [vmem:[%s6190_s2] sm:$0xff] }
  0x14   :  { %3226 = vmatprep.subr.mxu1 %v4393_v2  ;;  %3182 = vmatprep.subr.mxu0 %v45_v19  ;;  %v4789_v60 = vld [vmem:[%s6191_s4] ss:$0 sm:$0xff] }
  0x15   :  { %3227 = vmatpush3.msra.mxu1 %v4542_v20  ;;  %3183 = vmatpush3.msra.mxu0 %v45_v19 }
  0x16   :  { %3228 = vmatprep.subr.mxu1 %v4393_v2  ;;  %3184 = vmatprep.subr.mxu0 %v44_v21 }
  0x17   :  { %3229 = vmatpush3.msra.mxu1 %v4552_v22  ;;  %3185 = vmatpush3.msra.mxu0 %v44_v21 }
  0x18   :  { %3230 = vmatprep.subr.mxu1 %v4393_v2  ;;  %3186 = vmatprep.subr.mxu0 %v43_v23 }
  0x19   :  { %3231 = vmatpush3.msra.mxu1 %v4562_v24  ;;  %3187 = vmatpush3.msra.mxu0 %v43_v23 }
  0x1a   :  { %3232 = vmatprep.subr.mxu1 %v4393_v2  ;;  %3188 = vmatprep.subr.mxu0 %v42_v25 }
  0x1b   :  { %3233 = vmatpush3.msra.mxu1 %v4572_v26  ;;  %3189 = vmatpush3.msra.mxu0 %v42_v25 }
  0x1c   :  { %3234 = vmatprep.subr.mxu1 %v4393_v2  ;;  %3190 = vmatprep.subr.mxu0 %v41_v27 }
  0x1d   :  { %3235 = vmatpush3.msra.mxu1 %v4582_v28  ;;  %3191 = vmatpush3.msra.mxu0 %v41_v27 }
  0x1e   :  { %3236 = vmatprep.subr.mxu1 %v4393_v2  ;;  %3192 = vmatprep.subr.mxu0 %v40_v29 }
  0x1f   :  { %3196 = vmatprep.mubr.f32.mxu0 %v31_v30  ;;  %3193 = vmatpush3.msra.mxu0 %v40_v29 }
  0x20   :  { %3237 = vmatpush3.msra.mxu1 %v4596_v31  ;;  %3194 = vmatprep.subr.mxu0 %v39_v32 }
  0x21   :  { %3238 = vmatprep.subr.mxu1 %v4393_v2  ;;  %3195 = vmatpush3.msra.mxu0 %v39_v32 }
  0x22   :  { %3239 = vmatpush3.msra.mxu1 %v4605_v33  ;;  %3197 = vmatmul.mubr.f32.vlgmr.msra.gmra.mxu0 %v32_v34 }
  0x23   :  { %3241 = vmatmul.mubr.f32.vlgmr.msra.gmra.mxu1 %v209_v35  ;;  %3243 = vmatprep.subr.mxu0 %v4393_v2 }
  0x24   :  { %3278 = vmatprep.subr.mxu1 %v4393_v2  ;;  %3244 = vmatpush3.msra.mxu0 %v4619_v36 }
  0x25   :  { %3279 = vmatpush3.msra.mxu1 %v4455_v3  ;;  %3245 = vmatprep.subr.mxu0 %v4393_v2 }
  0x26   :  { %3280 = vmatprep.subr.mxu1 %v4393_v2  ;;  %3246 = vmatpush3.msra.mxu0 %v4626_v37 }
  0x27   :  { %3281 = vmatpush3.msra.mxu1 %v4463_v4  ;;  %3247 = vmatprep.subr.mxu0 %v4393_v2 }
  0x28   :  { %3282 = vmatprep.subr.mxu1 %v4393_v2  ;;  %3248 = vmatpush3.msra.mxu0 %v4635_v38 }
  0x29   :  { %3283 = vmatpush3.msra.mxu1 %v4472_v6  ;;  %3249 = vmatprep.subr.mxu0 %v4393_v2 }
  0x2a   :  { %3284 = vmatprep.subr.mxu1 %v4393_v2  ;;  %3250 = vmatpush3.msra.mxu0 %v4644_v39 }
  0x2b   :  { %3285 = vmatpush3.msra.mxu1 %v4482_v8  ;;  %3251 = vmatprep.subr.mxu0 %v4393_v2 }
  0x2c   :  { %3286 = vmatprep.subr.mxu1 %v4393_v2  ;;  %3252 = vmatpush3.msra.mxu0 %v4653_v40 }
  0x2d   :  { %3287 = vmatpush3.msra.mxu1 %v4492_v10  ;;  %3253 = vmatprep.subr.mxu0 %v4393_v2 }
  0x2e   :  { %3288 = vmatprep.subr.mxu1 %v4393_v2  ;;  %3254 = vmatpush3.msra.mxu0 %v4662_v41 }
  0x2f   :  { %3289 = vmatpush3.msra.mxu1 %v4502_v12  ;;  %3255 = vmatprep.subr.mxu0 %v4393_v2 }
  0x30   :  { %3290 = vmatprep.subr.mxu1 %v4393_v2  ;;  %3256 = vmatpush3.msra.mxu0 %v4671_v42 }
  0x31   :  { %3291 = vmatpush3.msra.mxu1 %v4512_v14  ;;  %3257 = vmatprep.subr.mxu0 %v4393_v2 }
  0x32   :  { %3292 = vmatprep.subr.mxu1 %v4393_v2  ;;  %3258 = vmatpush3.msra.mxu0 %v4680_v43 }
  0x33   :  { %3293 = vmatpush3.msra.mxu1 %v4522_v16  ;;  %3259 = vmatprep.subr.mxu0 %v4393_v2 }
  0x34   :  { %3294 = vmatprep.subr.mxu1 %v4393_v2  ;;  %3260 = vmatpush3.msra.mxu0 %v4689_v44 }
  0x35   :  { %3295 = vmatpush3.msra.mxu1 %v4532_v18  ;;  %3261 = vmatprep.subr.mxu0 %v4393_v2 }
  0x36   :  { %3296 = vmatprep.subr.mxu1 %v4393_v2  ;;  %3199 = vmatprep.mubr.f32.mxu0 %v33_v45 }
  0x37   :  { %3262 = vmatpush3.msra.mxu0 %v4701_v46  ;;  %3297 = vmatpush3.msra.mxu1 %v4542_v20 }
  0x38   :  { %3200 = vmatmul.mubr.f32.gmra.mxu0 %v34_v47  ;;  %3263 = vmatprep.subr.mxu0 %v4393_v2 }
  0x39   :  { %3298 = vmatprep.subr.mxu1 %v4393_v2  ;;  %3264 = vmatpush3.msra.mxu0 %v4714_v48 }
  0x3a   :  { %3299 = vmatpush3.msra.mxu1 %v4552_v22  ;;  %3265 = vmatprep.subr.mxu0 %v4393_v2 }
  0x3b   :  { %3300 = vmatprep.subr.mxu1 %v4393_v2  ;;  %3310 = vmatprep.mubr.msk.f32.mxu1 %vm4394_vm0, %v4393_v2 }
  0x3c   :  { %3301 = vmatpush3.msra.mxu1 %v4562_v24  ;;  %3202 = vmatprep.mubr.f32.mxu0 %v35_v49 }
  0x3d   :  { %3302 = vmatprep.subr.mxu1 %v4393_v2  ;;  %3266 = vmatpush3.msra.mxu0 %v4741_v50 }
  0x3e   :  { %3303 = vmatpush3.msra.mxu1 %v4572_v26  ;;  %3203 = vmatmul.mubr.f32.gmra.mxu0 %v36_v51 }
  0x3f   :  { %3304 = vmatprep.subr.mxu1 %v4393_v2  ;;  %3267 = vmatprep.subr.mxu0 %v4393_v2 }
  0x40   :  { %3305 = vmatpush3.msra.mxu1 %v4582_v28  ;;  %3268 = vmatpush3.msra.mxu0 %v4751_v52 }
  0x41   :  { %3306 = vmatprep.subr.mxu1 %v4393_v2  ;;  %3269 = vmatprep.subr.mxu0 %v4393_v2 }
  0x42   :  { %3307 = vmatpush3.msra.mxu1 %v4596_v31  ;;  %3205 = vmatprep.mubr.f32.mxu0 %v37_v53 }
  0x43   :  { %3308 = vmatprep.subr.mxu1 %v4393_v2  ;;  %3270 = vmatpush3.msra.mxu0 %v4761_v54 }
  0x44   :  { %3309 = vmatpush3.msra.mxu1 %v4605_v33  ;;  %3206 = vmatmul.mubr.f32.gmra.mxu0 %v38_v55 }
  0x45   :  { %3348 = vmatprep.subr.mxu1 %v4393_v2  ;;  %3271 = vmatprep.subr.mxu0 %v4393_v2 }
  0x46   :  { %3272 = vmatpush3.msra.mxu0 %v4771_v56  ;;  %3275 = vmatprep.mubr.msk.f32.mxu0 %vm4394_vm0, %v4393_v2 }
  0x47   :  { %3273 = vmatprep.subr.mxu0 %v4393_v2 }
  0x48   :  { %3274 = vmatpush3.msra.mxu0 %v4780_v57 }
  0x49   :  { %3313 = vmatprep.subr.mxu0 %v4393_v2 }
  0xe2   :  { %v4784_v58 = vpop.f32.mrf.mxu0 }
  0xe3   :  { %v277_v59 = vpop.f32.mrf.mxu1  ;;  %v134_v17 = vadd.f32 %v4784_v58, %v4789_v60 }
  0xe4   :  { %v128_v61 = vpop.f32.mrf.mxu0 }
  0xe5   :  { %v3242_v62 = vpop.f32.mrf.mxu1  ;;  %v129_v63 = vadd.f32 %v4789_v60, %v128_v61 }
  0xe7   :  { %v281_v0 = vadd.f32 %v277_v59, %v129_v63 }
  0xe9   :  { %v282_v1 = vmax.f32 %v281_v0, 0.0 }
  0xeb   :  { %3276 = vmatmul.mubr.f32.vlgmr.msra.gmra.mxu0 %v282_v1  ;;  %3311 = vmatmul.mubr.f32.vlgmr.msra.gmra.mxu1 %v282_v1  ;;  %v5096_v1 = vld [vmem:[%s6187_s3 + $0x78] sm:$0xff] }
  0xec   :  { %3314 = vmatpush3.msra.mxu0 %v4619_v36  ;;  %3349 = vmatpush3.msra.mxu1 %v4455_v3 }
  0xed   :  { %3315 = vmatprep.subr.mxu0 %v4393_v2  ;;  %3350 = vmatprep.subr.mxu1 %v4393_v2 }
  0xee   :  { %3316 = vmatpush3.msra.mxu0 %v4626_v37  ;;  %3351 = vmatpush3.msra.mxu1 %v4463_v4 }
  0xef   :  { %3317 = vmatprep.subr.mxu0 %v4393_v2  ;;  %3352 = vmatprep.subr.mxu1 %v4393_v2 }
  0xf0   :  { %3318 = vmatpush3.msra.mxu0 %v4635_v38  ;;  %3353 = vmatpush3.msra.mxu1 %v4472_v6 }
  0xf1   :  { %3319 = vmatprep.subr.mxu0 %v4393_v2  ;;  %3354 = vmatprep.subr.mxu1 %v4393_v2 }
  0xf2   :  { %3320 = vmatpush3.msra.mxu0 %v4644_v39  ;;  %3355 = vmatpush3.msra.mxu1 %v4482_v8 }
  0xf3   :  { %3321 = vmatprep.subr.mxu0 %v4393_v2  ;;  %3356 = vmatprep.subr.mxu1 %v4393_v2 }
  0xf4   :  { %3322 = vmatpush3.msra.mxu0 %v4653_v40  ;;  %3357 = vmatpush3.msra.mxu1 %v4492_v10 }
  0xf5   :  { %3323 = vmatprep.subr.mxu0 %v4393_v2  ;;  %3358 = vmatprep.subr.mxu1 %v4393_v2 }
  0xf6   :  { %3324 = vmatpush3.msra.mxu0 %v4662_v41  ;;  %3359 = vmatpush3.msra.mxu1 %v4502_v12 }
  0xf7   :  { %3325 = vmatprep.subr.mxu0 %v4393_v2  ;;  %3360 = vmatprep.subr.mxu1 %v4393_v2 }
  0xf8   :  { %3326 = vmatpush3.msra.mxu0 %v4671_v42  ;;  %3361 = vmatpush3.msra.mxu1 %v4512_v14  ;;  %v4860_v5 = vpop.f32.mrf.mxu0 }
  0xf9   :  { %3327 = vmatprep.subr.mxu0 %v4393_v2  ;;  %3362 = vmatprep.subr.mxu1 %v4393_v2  ;;  %v144_v51 = vadd.f32 %v4860_v5, %v4789_v60  ;;  %v5105_v5 = vld [vmem:[%s6187_s3 + $0x70] sm:$0xff] }
  0xfa   :  { %3328 = vmatpush3.msra.mxu0 %v4680_v43  ;;  %3363 = vmatpush3.msra.mxu1 %v4522_v16  ;;  %v4862_v7 = vpop.f32.mrf.mxu0 }
  0xfb   :  { %3329 = vmatprep.subr.mxu0 %v4393_v2  ;;  %3364 = vmatprep.subr.mxu1 %v4393_v2  ;;  %v139_v30 = vadd.f32 %v4789_v60, %v4862_v7  ;;  %v5114_v7 = vld [vmem:[%s6187_s3 + $0x68] sm:$0xff] }
  0xfc   :  { %3330 = vmatpush3.msra.mxu0 %v4689_v44  ;;  %3365 = vmatpush3.msra.mxu1 %v4532_v18 }
  0xfd   :  { %3331 = vmatprep.subr.mxu0 %v4393_v2  ;;  %3366 = vmatprep.subr.mxu1 %v4393_v2 }
  0xfe   :  { %3332 = vmatpush3.msra.mxu0 %v4701_v46  ;;  %3367 = vmatpush3.msra.mxu1 %v4542_v20  ;;  %v4864_v9 = vpop.f32.mrf.mxu0 }
  0xff   :  { %3333 = vmatprep.subr.mxu0 %v4393_v2  ;;  %3368 = vmatprep.subr.mxu1 %v4393_v2 }
 0x100   :  { %3334 = vmatpush3.msra.mxu0 %v4714_v48  ;;  %3369 = vmatpush3.msra.mxu1 %v4552_v22  ;;  %v4866_v11 = vpop.f32.mrf.mxu0 }
 0x101   :  { %3335 = vmatprep.subr.mxu0 %v4393_v2  ;;  %3370 = vmatprep.subr.mxu1 %v4393_v2 }
 0x102   :  { %3336 = vmatpush3.msra.mxu0 %v4741_v50  ;;  %3371 = vmatpush3.msra.mxu1 %v4562_v24 }
 0x103   :  { %3337 = vmatprep.subr.mxu0 %v4393_v2  ;;  %3372 = vmatprep.subr.mxu1 %v4393_v2 }
 0x104   :  { %3338 = vmatpush3.msra.mxu0 %v4751_v52  ;;  %3373 = vmatpush3.msra.mxu1 %v4572_v26  ;;  %v4868_v13 = vpop.f32.mrf.mxu0 }
 0x105   :  { %3339 = vmatprep.subr.mxu0 %v4393_v2  ;;  %3374 = vmatprep.subr.mxu1 %v4393_v2 }
 0x106   :  { %3340 = vmatpush3.msra.mxu0 %v4761_v54  ;;  %3375 = vmatpush3.msra.mxu1 %v4582_v28  ;;  %v4870_v15 = vpop.f32.mrf.mxu0 }
 0x107   :  { %3341 = vmatprep.subr.mxu0 %v4393_v2  ;;  %3376 = vmatprep.subr.mxu1 %v4393_v2 }
 0x108   :  { %3342 = vmatpush3.msra.mxu0 %v4771_v56  ;;  %3377 = vmatpush3.msra.mxu1 %v4596_v31 }
 0x109   :  { %3343 = vmatprep.subr.mxu0 %v4393_v2  ;;  %3378 = vmatprep.subr.mxu1 %v4393_v2 }
 0x10a   :  { %3344 = vmatpush3.msra.mxu0 %v4780_v57  ;;  %3345 = vmatprep.mubr.msk.f32.mxu0 %vm4394_vm0, %v4393_v2 }
 0x10b   :  { %3379 = vmatpush3.msra.mxu1 %v4605_v33  ;;  %3380 = vmatprep.mubr.msk.f32.mxu1 %vm4394_vm0, %v4393_v2 }
 0x10c   :  { %3383 = vmatprep.subr.mxu0 %v4393_v2  ;;  %3418 = vmatprep.subr.mxu1 %v4393_v2 }
 0x1ab   :  { %v4874_v19 = vpop.f32.mrf.mxu0  ;;  %v428_v21 = vpop.f32.mrf.mxu1 }
 0x1ac   :  { %v432_v23 = vadd.f32 %v428_v21, %v134_v17  ;;  %v5132_v17 = vld [vmem:[%s6187_s3 + $0x58] sm:$0xff]  ;;  %v4347_v21 = vld [vmem:[%s6190_s2 + $0x70] sm:$0xff] }
 0x1ad   :  { %v3277_v25 = vpop.f32.mrf.mxu0  ;;  %v3312_v27 = vpop.f32.mrf.mxu1 }
 0x1ae   :  { %v433_v29 = vmax.f32 %v432_v23, 0.0  ;;  %v5322_v23 = vld [vmem:[%s6187_s3 + $0xd8] sm:$0xff]  ;;  %v4348_v25 = vld [vmem:[%s6190_s2 + $0x68] sm:$0xff]  ;;  %v5333_v27 = vld [vmem:[%s6187_s3 + $0xd0] sm:$0xff] }
 0x1b0   :  { %3346 = vmatmul.mubr.f32.vlgmr.msra.gmra.mxu0 %v433_v29  ;;  %3381 = vmatmul.mubr.f32.vlgmr.msra.gmra.mxu1 %v433_v29  ;;  %v4349_v29 = vld [vmem:[%s6190_s2 + $0x60] sm:$0xff] }
 0x1b1   :  { %3384 = vmatpush3.msra.mxu0 %v4619_v36  ;;  %3419 = vmatpush3.msra.mxu1 %v4455_v3 }
 0x1b2   :  { %3385 = vmatprep.subr.mxu0 %v4393_v2  ;;  %3420 = vmatprep.subr.mxu1 %v4393_v2 }
 0x1b3   :  { %3386 = vmatpush3.msra.mxu0 %v4626_v37  ;;  %3421 = vmatpush3.msra.mxu1 %v4463_v4 }
 0x1b4   :  { %3387 = vmatprep.subr.mxu0 %v4393_v2  ;;  %3422 = vmatprep.subr.mxu1 %v4393_v2 }
 0x1b5   :  { %3388 = vmatpush3.msra.mxu0 %v4635_v38  ;;  %3423 = vmatpush3.msra.mxu1 %v4472_v6 }
 0x1b6   :  { %3389 = vmatprep.subr.mxu0 %v4393_v2  ;;  %3424 = vmatprep.subr.mxu1 %v4393_v2 }
 0x1b7   :  { %3390 = vmatpush3.msra.mxu0 %v4644_v39  ;;  %3425 = vmatpush3.msra.mxu1 %v4482_v8 }
 0x1b8   :  { %3391 = vmatprep.subr.mxu0 %v4393_v2  ;;  %3426 = vmatprep.subr.mxu1 %v4393_v2 }
 0x1b9   :  { %3392 = vmatpush3.msra.mxu0 %v4653_v40  ;;  %3427 = vmatpush3.msra.mxu1 %v4492_v10 }
 0x1ba   :  { %3393 = vmatprep.subr.mxu0 %v4393_v2  ;;  %3428 = vmatprep.subr.mxu1 %v4393_v2 }
 0x1bb   :  { %3394 = vmatpush3.msra.mxu0 %v4662_v41  ;;  %3429 = vmatpush3.msra.mxu1 %v4502_v12 }
 0x1bc   :  { %3395 = vmatprep.subr.mxu0 %v4393_v2  ;;  %3430 = vmatprep.subr.mxu1 %v4393_v2 }
 0x1bd   :  { %3396 = vmatpush3.msra.mxu0 %v4671_v42  ;;  %3431 = vmatpush3.msra.mxu1 %v4512_v14 }
 0x1be   :  { %3397 = vmatprep.subr.mxu0 %v4393_v2  ;;  %3432 = vmatprep.subr.mxu1 %v4393_v2 }
 0x1bf   :  { %3398 = vmatpush3.msra.mxu0 %v4680_v43  ;;  %3433 = vmatpush3.msra.mxu1 %v4522_v16 }
 0x1c0   :  { %3399 = vmatprep.subr.mxu0 %v4393_v2  ;;  %3434 = vmatprep.subr.mxu1 %v4393_v2 }
 0x1c1   :  { %3400 = vmatpush3.msra.mxu0 %v4689_v44  ;;  %3435 = vmatpush3.msra.mxu1 %v4532_v18 }
 0x1c2   :  { %3401 = vmatprep.subr.mxu0 %v4393_v2  ;;  %3436 = vmatprep.subr.mxu1 %v4393_v2 }
 0x1c3   :  { %3402 = vmatpush3.msra.mxu0 %v4701_v46  ;;  %3437 = vmatpush3.msra.mxu1 %v4542_v20 }
 0x1c4   :  { %3403 = vmatprep.subr.mxu0 %v4393_v2  ;;  %3438 = vmatprep.subr.mxu1 %v4393_v2 }
 0x1c5   :  { %3404 = vmatpush3.msra.mxu0 %v4714_v48  ;;  %3439 = vmatpush3.msra.mxu1 %v4552_v22 }
 0x1c6   :  { %3405 = vmatprep.subr.mxu0 %v4393_v2  ;;  %3440 = vmatprep.subr.mxu1 %v4393_v2 }
 0x1c7   :  { %3406 = vmatpush3.msra.mxu0 %v4741_v50  ;;  %3441 = vmatpush3.msra.mxu1 %v4562_v24 }
 0x1c8   :  { %3407 = vmatprep.subr.mxu0 %v4393_v2  ;;  %3442 = vmatprep.subr.mxu1 %v4393_v2 }
 0x1c9   :  { %3408 = vmatpush3.msra.mxu0 %v4751_v52  ;;  %3443 = vmatpush3.msra.mxu1 %v4572_v26 }
 0x1ca   :  { %3409 = vmatprep.subr.mxu0 %v4393_v2  ;;  %3444 = vmatprep.subr.mxu1 %v4393_v2 }
 0x1cb   :  { %3410 = vmatpush3.msra.mxu0 %v4761_v54  ;;  %3445 = vmatpush3.msra.mxu1 %v4582_v28 }
 0x1cc   :  { %3411 = vmatprep.subr.mxu0 %v4393_v2  ;;  %3446 = vmatprep.subr.mxu1 %v4393_v2 }
 0x1cd   :  { %3412 = vmatpush3.msra.mxu0 %v4771_v56  ;;  %3447 = vmatpush3.msra.mxu1 %v4596_v31 }
 0x1ce   :  { %3413 = vmatprep.subr.mxu0 %v4393_v2  ;;  %3448 = vmatprep.subr.mxu1 %v4393_v2 }
 0x1cf   :  { %3414 = vmatpush3.msra.mxu0 %v4780_v57  ;;  %3415 = vmatprep.mubr.msk.f32.mxu0 %vm4394_vm0, %v4393_v2 }
 0x1d0   :  { %3449 = vmatpush3.msra.mxu1 %v4605_v33  ;;  %3450 = vmatprep.mubr.msk.f32.mxu1 %vm4394_vm0, %v4393_v2 }
 0x1d1   :  { %3453 = vmatprep.subr.mxu0 %v4393_v2  ;;  %3488 = vmatprep.subr.mxu1 %v4393_v2 }
 0x270   :  { %v4946_v32 = vpop.f32.mrf.mxu0  ;;  %v572_v34 = vpop.f32.mrf.mxu1 }
 0x271   :  { %v576_v35 = vadd.f32 %v572_v34, %v139_v30  ;;  %v5344_v30 = vld [vmem:[%s6187_s3 + $0xc8] sm:$0xff]  ;;  %v4350_v34 = vld [vmem:[%s6190_s2 + $0x58] sm:$0xff] }
 0x272   :  { %v3347_v45 = vpop.f32.mrf.mxu0  ;;  %v3382_v47 = vpop.f32.mrf.mxu1 }
 0x273   :  { %v577_v49 = vmax.f32 %v576_v35, 0.0  ;;  %v5355_v35 = vld [vmem:[%s6187_s3 + $0xc0] sm:$0xff]  ;;  %v4351_v45 = vld [vmem:[%s6190_s2 + $0x50] sm:$0xff]  ;;  %v5366_v47 = vld [vmem:[%s6187_s3 + $0xb8] sm:$0xff] }
 0x275   :  { %3416 = vmatmul.mubr.f32.vlgmr.msra.gmra.mxu0 %v577_v49  ;;  %3451 = vmatmul.mubr.f32.vlgmr.msra.gmra.mxu1 %v577_v49  ;;  %v4352_v49 = vld [vmem:[%s6190_s2 + $0x48] sm:$0xff] }
 0x276   :  { %3454 = vmatpush3.msra.mxu0 %v4619_v36  ;;  %3489 = vmatpush3.msra.mxu1 %v4455_v3 }
 0x277   :  { %3455 = vmatprep.subr.mxu0 %v4393_v2  ;;  %3490 = vmatprep.subr.mxu1 %v4393_v2 }
 0x278   :  { %3456 = vmatpush3.msra.mxu0 %v4626_v37  ;;  %3491 = vmatpush3.msra.mxu1 %v4463_v4 }
 0x279   :  { %3457 = vmatprep.subr.mxu0 %v4393_v2  ;;  %3492 = vmatprep.subr.mxu1 %v4393_v2 }
 0x27a   :  { %3458 = vmatpush3.msra.mxu0 %v4635_v38  ;;  %3493 = vmatpush3.msra.mxu1 %v4472_v6 }
 0x27b   :  { %3459 = vmatprep.subr.mxu0 %v4393_v2  ;;  %3494 = vmatprep.subr.mxu1 %v4393_v2 }
 0x27c   :  { %3460 = vmatpush3.msra.mxu0 %v4644_v39  ;;  %3495 = vmatpush3.msra.mxu1 %v4482_v8 }
 0x27d   :  { %3461 = vmatprep.subr.mxu0 %v4393_v2  ;;  %3496 = vmatprep.subr.mxu1 %v4393_v2 }
 0x27e   :  { %3462 = vmatpush3.msra.mxu0 %v4653_v40  ;;  %3497 = vmatpush3.msra.mxu1 %v4492_v10 }
 0x27f   :  { %3463 = vmatprep.subr.mxu0 %v4393_v2  ;;  %3498 = vmatprep.subr.mxu1 %v4393_v2 }
 0x280   :  { %3464 = vmatpush3.msra.mxu0 %v4662_v41  ;;  %3499 = vmatpush3.msra.mxu1 %v4502_v12 }
 0x281   :  { %3465 = vmatprep.subr.mxu0 %v4393_v2  ;;  %3500 = vmatprep.subr.mxu1 %v4393_v2 }
 0x282   :  { %3466 = vmatpush3.msra.mxu0 %v4671_v42  ;;  %3501 = vmatpush3.msra.mxu1 %v4512_v14 }
 0x283   :  { %3467 = vmatprep.subr.mxu0 %v4393_v2  ;;  %3502 = vmatprep.subr.mxu1 %v4393_v2 }
 0x284   :  { %3468 = vmatpush3.msra.mxu0 %v4680_v43  ;;  %3503 = vmatpush3.msra.mxu1 %v4522_v16 }
 0x285   :  { %3469 = vmatprep.subr.mxu0 %v4393_v2  ;;  %3504 = vmatprep.subr.mxu1 %v4393_v2 }
 0x286   :  { %3470 = vmatpush3.msra.mxu0 %v4689_v44  ;;  %3505 = vmatpush3.msra.mxu1 %v4532_v18 }
 0x287   :  { %3471 = vmatprep.subr.mxu0 %v4393_v2  ;;  %3506 = vmatprep.subr.mxu1 %v4393_v2 }
 0x288   :  { %3472 = vmatpush3.msra.mxu0 %v4701_v46  ;;  %3507 = vmatpush3.msra.mxu1 %v4542_v20 }
 0x289   :  { %3473 = vmatprep.subr.mxu0 %v4393_v2  ;;  %3508 = vmatprep.subr.mxu1 %v4393_v2 }
 0x28a   :  { %3474 = vmatpush3.msra.mxu0 %v4714_v48  ;;  %3509 = vmatpush3.msra.mxu1 %v4552_v22 }
 0x28b   :  { %3475 = vmatprep.subr.mxu0 %v4393_v2  ;;  %3510 = vmatprep.subr.mxu1 %v4393_v2 }
 0x28c   :  { %3476 = vmatpush3.msra.mxu0 %v4741_v50  ;;  %3511 = vmatpush3.msra.mxu1 %v4562_v24 }
 0x28d   :  { %3477 = vmatprep.subr.mxu0 %v4393_v2  ;;  %3512 = vmatprep.subr.mxu1 %v4393_v2 }
 0x28e   :  { %3478 = vmatpush3.msra.mxu0 %v4751_v52  ;;  %3513 = vmatpush3.msra.mxu1 %v4572_v26 }
 0x28f   :  { %3479 = vmatprep.subr.mxu0 %v4393_v2  ;;  %3514 = vmatprep.subr.mxu1 %v4393_v2 }
 0x290   :  { %3480 = vmatpush3.msra.mxu0 %v4761_v54  ;;  %3515 = vmatpush3.msra.mxu1 %v4582_v28 }
 0x291   :  { %3481 = vmatprep.subr.mxu0 %v4393_v2  ;;  %3516 = vmatprep.subr.mxu1 %v4393_v2 }
 0x292   :  { %3482 = vmatpush3.msra.mxu0 %v4771_v56  ;;  %3517 = vmatpush3.msra.mxu1 %v4596_v31 }
 0x293   :  { %3483 = vmatprep.subr.mxu0 %v4393_v2  ;;  %3518 = vmatprep.subr.mxu1 %v4393_v2 }
 0x294   :  { %3484 = vmatpush3.msra.mxu0 %v4780_v57  ;;  %3485 = vmatprep.mubr.msk.f32.mxu0 %vm4394_vm0, %v4393_v2 }
 0x295   :  { %3519 = vmatpush3.msra.mxu1 %v4605_v33  ;;  %3520 = vmatprep.mubr.msk.f32.mxu1 %vm4394_vm0, %v4393_v2 }
 0x296   :  { %3523 = vmatprep.subr.mxu0 %v4393_v2  ;;  %3558 = vmatprep.subr.mxu1 %v4393_v2 }
 0x335   :  { %v5018_v53 = vpop.f32.mrf.mxu0  ;;  %v716_v55 = vpop.f32.mrf.mxu1 }
 0x336   :  { %v720_v58 = vadd.f32 %v716_v55, %v144_v51  ;;  %v5377_v51 = vld [vmem:[%s6187_s3 + $0xb0] sm:$0xff]  ;;  %v4353_v55 = vld [vmem:[%s6190_s2 + $0x40] sm:$0xff] }
 0x337   :  { %v3417_v59 = vpop.f32.mrf.mxu0  ;;  %v3452_v61 = vpop.f32.mrf.mxu1 }
 0x338   :  { %v721_v62 = vmax.f32 %v720_v58, 0.0  ;;  %v5388_v58 = vld [vmem:[%s6187_s3 + $0xa8] sm:$0xff]  ;;  %v4354_v59 = vld [vmem:[%s6190_s2 + $0x38] sm:$0xff]  ;;  %v5399_v61 = vld [vmem:[%s6187_s3 + $0xa0] sm:$0xff] }
 0x33a   :  { %3486 = vmatmul.mubr.f32.vlgmr.msra.gmra.mxu0 %v721_v62  ;;  %3521 = vmatmul.mubr.f32.vlgmr.msra.gmra.mxu1 %v721_v62  ;;  %v4355_v62 = vld [vmem:[%s6190_s2 + $0x30] sm:$0xff] }
 0x33b   :  { %3524 = vmatpush3.msra.mxu0 %v4619_v36  ;;  %3559 = vmatpush3.msra.mxu1 %v4455_v3  ;;  %v149_v3 = vadd.f32 %v4789_v60, %v4866_v11  ;;  %v5123_v11 = vld [vmem:[%s6187_s3 + $0x60] sm:$0xff] }
 0x33c   :  { %3525 = vmatprep.subr.mxu0 %v4393_v2  ;;  %3560 = vmatprep.subr.mxu1 %v4393_v2 }
 0x33d   :  { %3526 = vmatpush3.msra.mxu0 %v4626_v37  ;;  %3561 = vmatpush3.msra.mxu1 %v4463_v4 }
 0x33e   :  { %3527 = vmatprep.subr.mxu0 %v4393_v2  ;;  %3562 = vmatprep.subr.mxu1 %v4393_v2 }
 0x33f   :  { %3528 = vmatpush3.msra.mxu0 %v4635_v38  ;;  %3563 = vmatpush3.msra.mxu1 %v4472_v6 }
 0x340   :  { %3529 = vmatprep.subr.mxu0 %v4393_v2  ;;  %3564 = vmatprep.subr.mxu1 %v4393_v2 }
 0x341   :  { %3530 = vmatpush3.msra.mxu0 %v4644_v39  ;;  %3565 = vmatpush3.msra.mxu1 %v4482_v8 }
 0x342   :  { %3531 = vmatprep.subr.mxu0 %v4393_v2  ;;  %3566 = vmatprep.subr.mxu1 %v4393_v2 }
 0x343   :  { %3532 = vmatpush3.msra.mxu0 %v4653_v40  ;;  %3567 = vmatpush3.msra.mxu1 %v4492_v10 }
 0x344   :  { %3533 = vmatprep.subr.mxu0 %v4393_v2  ;;  %3568 = vmatprep.subr.mxu1 %v4393_v2 }
 0x345   :  { %3534 = vmatpush3.msra.mxu0 %v4662_v41  ;;  %3569 = vmatpush3.msra.mxu1 %v4502_v12 }
 0x346   :  { %3535 = vmatprep.subr.mxu0 %v4393_v2  ;;  %3570 = vmatprep.subr.mxu1 %v4393_v2 }
 0x347   :  { %3536 = vmatpush3.msra.mxu0 %v4671_v42  ;;  %3571 = vmatpush3.msra.mxu1 %v4512_v14 }
 0x348   :  { %3537 = vmatprep.subr.mxu0 %v4393_v2  ;;  %3572 = vmatprep.subr.mxu1 %v4393_v2 }
 0x349   :  { %3538 = vmatpush3.msra.mxu0 %v4680_v43  ;;  %3573 = vmatpush3.msra.mxu1 %v4522_v16 }
 0x34a   :  { %3539 = vmatprep.subr.mxu0 %v4393_v2  ;;  %3574 = vmatprep.subr.mxu1 %v4393_v2 }
 0x34b   :  { %3540 = vmatpush3.msra.mxu0 %v4689_v44  ;;  %3575 = vmatpush3.msra.mxu1 %v4532_v18 }
 0x34c   :  { %3541 = vmatprep.subr.mxu0 %v4393_v2  ;;  %3576 = vmatprep.subr.mxu1 %v4393_v2 }
 0x34d   :  { %3542 = vmatpush3.msra.mxu0 %v4701_v46  ;;  %3577 = vmatpush3.msra.mxu1 %v4542_v20 }
 0x34e   :  { %3543 = vmatprep.subr.mxu0 %v4393_v2  ;;  %3578 = vmatprep.subr.mxu1 %v4393_v2 }
 0x34f   :  { %3544 = vmatpush3.msra.mxu0 %v4714_v48  ;;  %3579 = vmatpush3.msra.mxu1 %v4552_v22 }
 0x350   :  { %3545 = vmatprep.subr.mxu0 %v4393_v2  ;;  %3580 = vmatprep.subr.mxu1 %v4393_v2 }
 0x351   :  { %3546 = vmatpush3.msra.mxu0 %v4741_v50  ;;  %3581 = vmatpush3.msra.mxu1 %v4562_v24 }
 0x352   :  { %3547 = vmatprep.subr.mxu0 %v4393_v2  ;;  %3582 = vmatprep.subr.mxu1 %v4393_v2 }
 0x353   :  { %3548 = vmatpush3.msra.mxu0 %v4751_v52  ;;  %3583 = vmatpush3.msra.mxu1 %v4572_v26 }
 0x354   :  { %3549 = vmatprep.subr.mxu0 %v4393_v2  ;;  %3584 = vmatprep.subr.mxu1 %v4393_v2 }
 0x355   :  { %3550 = vmatpush3.msra.mxu0 %v4761_v54  ;;  %3585 = vmatpush3.msra.mxu1 %v4582_v28 }
 0x356   :  { %3551 = vmatprep.subr.mxu0 %v4393_v2  ;;  %3586 = vmatprep.subr.mxu1 %v4393_v2 }
 0x357   :  { %3552 = vmatpush3.msra.mxu0 %v4771_v56  ;;  %3587 = vmatpush3.msra.mxu1 %v4596_v31 }
 0x358   :  { %3553 = vmatprep.subr.mxu0 %v4393_v2  ;;  %3588 = vmatprep.subr.mxu1 %v4393_v2 }
 0x359   :  { %3554 = vmatpush3.msra.mxu0 %v4780_v57  ;;  %3555 = vmatprep.mubr.msk.f32.mxu0 %vm4394_vm0, %v4393_v2 }
 0x35a   :  { %3589 = vmatpush3.msra.mxu1 %v4605_v33  ;;  %3590 = vmatprep.mubr.msk.f32.mxu1 %vm4394_vm0, %v4393_v2 }
 0x35b   :  { %3593 = vmatprep.subr.mxu0 %v4393_v2  ;;  %3628 = vmatprep.subr.mxu1 %v4393_v2 }
 0x3fa   :  { %v5090_v4 = vpop.f32.mrf.mxu0  ;;  %v860_v6 = vpop.f32.mrf.mxu1 }
 0x3fb   :  { %v864_v8 = vadd.f32 %v860_v6, %v149_v3  ;;  %v5410_v3 = vld [vmem:[%s6187_s3 + $0x98] sm:$0xff]  ;;  %v4356_v6 = vld [vmem:[%s6190_s2 + $0x28] sm:$0xff] }
 0x3fc   :  { %v3487_v10 = vpop.f32.mrf.mxu0  ;;  %v3522_v63 = vpop.f32.mrf.mxu1 }
 0x3fd   :  { %v865_v0 = vmax.f32 %v864_v8, 0.0  ;;  %v5421_v8 = vld [vmem:[%s6187_s3 + $0x90] sm:$0xff]  ;;  %v4357_v10 = vld [vmem:[%s6190_s2 + $0x20] sm:$0xff]  ;;  %v5432_v63 = vld [vmem:[%s6187_s3 + $0x88] sm:$0xff] }
 0x3ff   :  { %3556 = vmatmul.mubr.f32.vlgmr.msra.gmra.mxu0 %v865_v0  ;;  %3591 = vmatmul.mubr.f32.vlgmr.msra.gmra.mxu1 %v865_v0  ;;  %v4358_v0 = vld [vmem:[%s6190_s2 + $0x18] sm:$0xff] }
 0x400   :  { %3594 = vmatpush3.msra.mxu0 %v4619_v36  ;;  %3629 = vmatpush3.msra.mxu1 %v5096_v1 }
 0x401   :  { %3595 = vmatprep.subr.mxu0 %v4393_v2  ;;  %3630 = vmatprep.subr.mxu1 %v4393_v2 }
 0x402   :  { %3596 = vmatpush3.msra.mxu0 %v4626_v37  ;;  %3631 = vmatpush3.msra.mxu1 %v5105_v5 }
 0x403   :  { %3597 = vmatprep.subr.mxu0 %v4393_v2  ;;  %3632 = vmatprep.subr.mxu1 %v4393_v2 }
 0x404   :  { %3598 = vmatpush3.msra.mxu0 %v4635_v38  ;;  %3633 = vmatpush3.msra.mxu1 %v5114_v7 }
 0x405   :  { %3599 = vmatprep.subr.mxu0 %v4393_v2  ;;  %3634 = vmatprep.subr.mxu1 %v4393_v2 }
 0x406   :  { %3600 = vmatpush3.msra.mxu0 %v4644_v39  ;;  %3635 = vmatpush3.msra.mxu1 %v5123_v11 }
 0x407   :  { %3601 = vmatprep.subr.mxu0 %v4393_v2  ;;  %3636 = vmatprep.subr.mxu1 %v4393_v2 }
 0x408   :  { %3602 = vmatpush3.msra.mxu0 %v4653_v40  ;;  %3637 = vmatpush3.msra.mxu1 %v5132_v17 }
 0x409   :  { %3603 = vmatprep.subr.mxu0 %v4393_v2  ;;  %3638 = vmatprep.subr.mxu1 %v4393_v2 }
 0x40a   :  { %3604 = vmatpush3.msra.mxu0 %v4662_v41  ;;  %3639 = vmatpush3.msra.mxu1 %v4502_v12  ;;  %v154_v12 = vadd.f32 %v4864_v9, %v4789_v60  ;;  %v4346_v9 = vld [vmem:[%s6190_s2 + $0x78] sm:$0xff] }
 0x40b   :  { %3605 = vmatprep.subr.mxu0 %v4393_v2  ;;  %3640 = vmatprep.subr.mxu1 %v4393_v2 }
 0x40c   :  { %3606 = vmatpush3.msra.mxu0 %v4671_v42  ;;  %3641 = vmatpush3.msra.mxu1 %v4512_v14 }
 0x40d   :  { %3607 = vmatprep.subr.mxu0 %v4393_v2  ;;  %3642 = vmatprep.subr.mxu1 %v4393_v2 }
 0x40e   :  { %3608 = vmatpush3.msra.mxu0 %v4680_v43  ;;  %3643 = vmatpush3.msra.mxu1 %v4522_v16 }
 0x40f   :  { %3609 = vmatprep.subr.mxu0 %v4393_v2  ;;  %3644 = vmatprep.subr.mxu1 %v4393_v2 }
 0x410   :  { %3610 = vmatpush3.msra.mxu0 %v4689_v44  ;;  %3645 = vmatpush3.msra.mxu1 %v4532_v18 }
 0x411   :  { %3611 = vmatprep.subr.mxu0 %v4393_v2  ;;  %3646 = vmatprep.subr.mxu1 %v4393_v2 }
 0x412   :  { %3612 = vmatpush3.msra.mxu0 %v4701_v46  ;;  %3647 = vmatpush3.msra.mxu1 %v4542_v20 }
 0x413   :  { %3613 = vmatprep.subr.mxu0 %v4393_v2  ;;  %3648 = vmatprep.subr.mxu1 %v4393_v2 }
 0x414   :  { %3614 = vmatpush3.msra.mxu0 %v4714_v48  ;;  %3649 = vmatpush3.msra.mxu1 %v4552_v22 }
 0x415   :  { %3615 = vmatprep.subr.mxu0 %v4393_v2  ;;  %3650 = vmatprep.subr.mxu1 %v4393_v2 }
 0x416   :  { %3616 = vmatpush3.msra.mxu0 %v4741_v50  ;;  %3651 = vmatpush3.msra.mxu1 %v4562_v24 }
 0x417   :  { %3617 = vmatprep.subr.mxu0 %v4393_v2  ;;  %3652 = vmatprep.subr.mxu1 %v4393_v2 }
 0x418   :  { %3618 = vmatpush3.msra.mxu0 %v4751_v52  ;;  %3653 = vmatpush3.msra.mxu1 %v4572_v26  ;;  %v4335_v26 = vld [vmem:[%s6187_s3 + $0x50] sm:$0xff] }
 0x419   :  { %3619 = vmatprep.subr.mxu0 %v4393_v2  ;;  %3654 = vmatprep.subr.mxu1 %v4393_v2 }
 0x41a   :  { %3620 = vmatpush3.msra.mxu0 %v4761_v54  ;;  %3655 = vmatpush3.msra.mxu1 %v4582_v28  ;;  %v4336_v28 = vld [vmem:[%s6187_s3 + $0x48] sm:$0xff] }
 0x41b   :  { %3621 = vmatprep.subr.mxu0 %v4393_v2  ;;  %3656 = vmatprep.subr.mxu1 %v4393_v2 }
 0x41c   :  { %3622 = vmatpush3.msra.mxu0 %v4771_v56  ;;  %3657 = vmatpush3.msra.mxu1 %v4596_v31  ;;  %v4337_v31 = vld [vmem:[%s6187_s3 + $0x40] sm:$0xff] }
 0x41d   :  { %3623 = vmatprep.subr.mxu0 %v4393_v2  ;;  %3658 = vmatprep.subr.mxu1 %v4393_v2 }
 0x41e   :  { %3624 = vmatpush3.msra.mxu0 %v4780_v57  ;;  %3625 = vmatprep.mubr.msk.f32.mxu0 %vm4394_vm0, %v4393_v2 }
 0x41f   :  { %3659 = vmatpush3.msra.mxu1 %v4605_v33  ;;  %3660 = vmatprep.mubr.msk.f32.mxu1 %vm4394_vm0, %v4393_v2  ;;  %v4338_v33 = vld [vmem:[%s6187_s3 + $0x38] sm:$0xff] }
 0x420   :  { %3698 = vmatprep.subr.mxu1 %v4393_v2  ;;  %3663 = vmatprep.subr.mxu0 %v4393_v2 }
 0x4bf   :  { %v5187_v14 = vpop.f32.mrf.mxu0  ;;  %v1004_v16 = vpop.f32.mrf.mxu1 }
 0x4c0   :  { %v1008_v18 = vadd.f32 %v1004_v16, %v154_v12  ;;  %v4362_v12 = vld [vmem:[%s6191_s4] ss:$0 sm:$0xff] }
 0x4c1   :  { %v3557_v20 = vpop.f32.mrf.mxu0  ;;  %v3592_v22 = vpop.f32.mrf.mxu1  ;;  %v164_v16 = vadd.f32 %v4362_v12, %v4868_v13  ;;  %v5517_v13 = vld [vmem:[%s6192_s6 + $0x70] sm:$0xff] }
 0x4c2   :  { %v1009_v24 = vmax.f32 %v1008_v18, 0.0 }
 0x4c4   :  { %3626 = vmatmul.mubr.f32.vlgmr.msra.gmra.mxu0 %v1009_v24  ;;  %3661 = vmatmul.mubr.f32.vlgmr.msra.gmra.mxu1 %v1009_v24 }
 0x4c5   :  { %3699 = vmatpush3.msra.mxu1 %v5096_v1  ;;  %3664 = vmatpush3.msra.mxu0 %v4619_v36  ;;  %v4339_v36 = vld [vmem:[%s6187_s3 + $0x30] sm:$0xff]  ;;  %v5443_v1 = vld [vmem:[%s6187_s3 + $0x80] sm:$0xff] }
 0x4c6   :  { %3700 = vmatprep.subr.mxu1 %v4393_v2  ;;  %3665 = vmatprep.subr.mxu0 %v4393_v2 }
 0x4c7   :  { %3701 = vmatpush3.msra.mxu1 %v5105_v5  ;;  %3666 = vmatpush3.msra.mxu0 %v4626_v37  ;;  %v4340_v37 = vld [vmem:[%s6187_s3 + $0x28] sm:$0xff]  ;;  %v4359_v5 = vld [vmem:[%s6190_s2 + $0x10] sm:$0xff] }
 0x4c8   :  { %3702 = vmatprep.subr.mxu1 %v4393_v2  ;;  %3667 = vmatprep.subr.mxu0 %v4393_v2 }
 0x4c9   :  { %3703 = vmatpush3.msra.mxu1 %v5114_v7  ;;  %3668 = vmatpush3.msra.mxu0 %v4635_v38  ;;  %v4341_v38 = vld [vmem:[%s6187_s3 + $0x20] sm:$0xff]  ;;  %v2593_v7 = vld [vmem:[%s6189_s5 + $0x8] sm:$0xff] }
 0x4ca   :  { %3704 = vmatprep.subr.mxu1 %v4393_v2  ;;  %3669 = vmatprep.subr.mxu0 %v4393_v2 }
 0x4cb   :  { %3705 = vmatpush3.msra.mxu1 %v5123_v11  ;;  %3670 = vmatpush3.msra.mxu0 %v4644_v39  ;;  %v4342_v39 = vld [vmem:[%s6187_s3 + $0x18] sm:$0xff]  ;;  %v4360_v11 = vld [vmem:[%s6190_s2 + $0x8] sm:$0xff] }
 0x4cc   :  { %3706 = vmatprep.subr.mxu1 %v4393_v2  ;;  %3671 = vmatprep.subr.mxu0 %v4393_v2 }
 0x4cd   :  { %3707 = vmatpush3.msra.mxu1 %v5132_v17  ;;  %3672 = vmatpush3.msra.mxu0 %v4653_v40  ;;  %v4343_v40 = vld [vmem:[%s6187_s3 + $0x10] sm:$0xff]  ;;  %v4361_v17 = vld [vmem:[%s6190_s2] sm:$0xff] }
 0x4ce   :  { %3708 = vmatprep.subr.mxu1 %v4393_v2  ;;  %3673 = vmatprep.subr.mxu0 %v4393_v2 }
 0x4cf   :  { %3709 = vmatpush3.msra.mxu1 %v4335_v26  ;;  %3674 = vmatpush3.msra.mxu0 %v4662_v41  ;;  %v4344_v41 = vld [vmem:[%s6187_s3 + $0x8] sm:$0xff] }
 0x4d0   :  { %3710 = vmatprep.subr.mxu1 %v4393_v2  ;;  %3675 = vmatprep.subr.mxu0 %v4393_v2 }
 0x4d1   :  { %3711 = vmatpush3.msra.mxu1 %v4336_v28  ;;  %3676 = vmatpush3.msra.mxu0 %v4671_v42  ;;  %v4345_v42 = vld [vmem:[%s6187_s3] sm:$0xff] }
 0x4d2   :  { %3712 = vmatprep.subr.mxu1 %v4393_v2  ;;  %3677 = vmatprep.subr.mxu0 %v4393_v2 }
 0x4d3   :  { %3713 = vmatpush3.msra.mxu1 %v4337_v31  ;;  %3678 = vmatpush3.msra.mxu0 %v4680_v43  ;;  %v159_v43 = vadd.f32 %v4789_v60, %v4870_v15  ;;  %v5300_v60 = vld [vmem:[%s6187_s3 + $0xe8] sm:$0xff]  ;;  %v5311_v15 = vld [vmem:[%s6187_s3 + $0xe0] sm:$0xff]  ;;  %v5509_v31 = vld [vmem:[%s6192_s6 + $0x78] sm:$0xff] }
 0x4d4   :  { %3714 = vmatprep.subr.mxu1 %v4393_v2  ;;  %3679 = vmatprep.subr.mxu0 %v4393_v2 }
 0x4d5   :  { %3715 = vmatpush3.msra.mxu1 %v4338_v33  ;;  %3680 = vmatpush3.msra.mxu0 %v4689_v44  ;;  %v5526_v33 = vld [vmem:[%s6192_s6 + $0x68] sm:$0xff] }
 0x4d6   :  { %3716 = vmatprep.subr.mxu1 %v4393_v2  ;;  %3681 = vmatprep.subr.mxu0 %v4393_v2 }
 0x4d7   :  { %3717 = vmatpush3.msra.mxu1 %v4339_v36  ;;  %3682 = vmatpush3.msra.mxu0 %v4701_v46  ;;  %v5533_v36 = vld [vmem:[%s6192_s6 + $0x60] sm:$0xff] }
 0x4d8   :  { %3718 = vmatprep.subr.mxu1 %v4393_v2  ;;  %3683 = vmatprep.subr.mxu0 %v4393_v2 }
 0x4d9   :  { %3719 = vmatpush3.msra.mxu1 %v4340_v37  ;;  %3684 = vmatpush3.msra.mxu0 %v4714_v48  ;;  %v5540_v37 = vld [vmem:[%s6192_s6 + $0x58] sm:$0xff] }
 0x4da   :  { %3720 = vmatprep.subr.mxu1 %v4393_v2  ;;  %3685 = vmatprep.subr.mxu0 %v4393_v2 }
 0x4db   :  { %3721 = vmatpush3.msra.mxu1 %v4341_v38  ;;  %3686 = vmatpush3.msra.mxu0 %v4741_v50  ;;  %v5547_v38 = vld [vmem:[%s6192_s6 + $0x50] sm:$0xff] }
 0x4dc   :  { %3722 = vmatprep.subr.mxu1 %v4393_v2  ;;  %3687 = vmatprep.subr.mxu0 %v4393_v2 }
 0x4dd   :  { %3723 = vmatpush3.msra.mxu1 %v4342_v39  ;;  %3688 = vmatpush3.msra.mxu0 %v4751_v52  ;;  %v5554_v39 = vld [vmem:[%s6192_s6 + $0x48] sm:$0xff] }
 0x4de   :  { %3724 = vmatprep.subr.mxu1 %v4393_v2  ;;  %3689 = vmatprep.subr.mxu0 %v4393_v2 }
 0x4df   :  { %3725 = vmatpush3.msra.mxu1 %v4343_v40  ;;  %3690 = vmatpush3.msra.mxu0 %v4761_v54  ;;  %v5561_v40 = vld [vmem:[%s6192_s6 + $0x40] sm:$0xff] }
 0x4e0   :  { %3726 = vmatprep.subr.mxu1 %v4393_v2  ;;  %3691 = vmatprep.subr.mxu0 %v4393_v2 }
 0x4e1   :  { %3727 = vmatpush3.msra.mxu1 %v4344_v41  ;;  %3692 = vmatpush3.msra.mxu0 %v4771_v56  ;;  %v5286_v56 = vld [vmem:[%s6187_s3 + $0xf8] sm:$0xff] }
 0x4e2   :  { %3728 = vmatprep.subr.mxu1 %v4393_v2  ;;  %3693 = vmatprep.subr.mxu0 %v4393_v2  ;;  %v5568_v41 = vld [vmem:[%s6192_s6 + $0x38] sm:$0xff] }
 0x4e3   :  { %3729 = vmatpush3.msra.mxu1 %v4345_v42  ;;  %3694 = vmatpush3.msra.mxu0 %v4780_v57  ;;  %v5291_v57 = vld [vmem:[%s6187_s3 + $0xf0] sm:$0xff] }
 0x4e4   :  { %3695 = vmatprep.mubr.msk.f32.mxu0 %vm4394_vm0, %v4393_v2  ;;  %3730 = vmatprep.mubr.msk.f32.mxu1 %vm4394_vm0, %v4393_v2  ;;  %v5575_v42 = vld [vmem:[%s6192_s6 + $0x30] sm:$0xff] }
 0x4e5   :  { %3768 = vmatprep.subr.mxu1 %v4393_v2  ;;  %3733 = vmatprep.subr.mxu0 %v4393_v2 }
 0x584   :  { %v5281_v44 = vpop.f32.mrf.mxu0  ;;  %v1148_v46 = vpop.f32.mrf.mxu1 }
 0x585   :  { %v1152_v48 = vadd.f32 %v1148_v46, %v159_v43  ;;  %v5582_v43 = vld [vmem:[%s6192_s6 + $0x28] sm:$0xff]  ;;  %v5589_v46 = vld [vmem:[%s6192_s6 + $0x20] sm:$0xff] }
 0x586   :  { %v3627_v50 = vpop.f32.mrf.mxu0  ;;  %v3662_v52 = vpop.f32.mrf.mxu1 }
 0x587   :  { %v1153_v54 = vmax.f32 %v1152_v48, 0.0  ;;  %v5596_v48 = vld [vmem:[%s6192_s6 + $0x18] sm:$0xff]  ;;  %v5601_v50 = vld [vmem:[%s6191_s4 + $0x1] ss:$0 sm:$0xff]  ;;  %v5608_v52 = vld [vmem:[%s6192_s6 + $0x10] sm:$0xff] }
 0x589   :  { %3696 = vmatmul.mubr.f32.vlgmr.msra.gmra.mxu0 %v1153_v54  ;;  %3731 = vmatmul.mubr.f32.vlgmr.msra.gmra.mxu1 %v1153_v54  ;;  %v356_v54 = vadd.f32 %v5601_v50, %v4874_v19 }
 0x58a   :  { %3769 = vmatpush3.msra.mxu1 %v5286_v56  ;;  %3800 = vmatprep.mubr.msk.f32.mxu1 %vm4394_vm0, %v4393_v2 }
 0x58b   :  { %3770 = vmatprep.subr.mxu1 %v4393_v2  ;;  %3734 = vmatpush3.msra.mxu0 %v4346_v9  ;;  %v5617_v9 = vld [vmem:[%s6192_s6 + $0x8] sm:$0xff] }
 0x58c   :  { %3771 = vmatpush3.msra.mxu1 %v5291_v57  ;;  %3735 = vmatprep.subr.mxu0 %v4393_v2 }
 0x58d   :  { %3772 = vmatprep.subr.mxu1 %v4393_v2  ;;  %3736 = vmatpush3.msra.mxu0 %v4347_v21 }
 0x58e   :  { %3773 = vmatpush3.msra.mxu1 %v5300_v60  ;;  %3737 = vmatprep.subr.mxu0 %v4393_v2 }
 0x58f   :  { %3774 = vmatprep.subr.mxu1 %v4393_v2  ;;  %3738 = vmatpush3.msra.mxu0 %v4348_v25 }
 0x590   :  { %3775 = vmatpush3.msra.mxu1 %v5311_v15  ;;  %3739 = vmatprep.subr.mxu0 %v4393_v2 }
 0x591   :  { %3776 = vmatprep.subr.mxu1 %v4393_v2  ;;  %3740 = vmatpush3.msra.mxu0 %v4349_v29  ;;  %v5624_v29 = vld [vmem:[%s6192_s6] sm:$0xff] }
 0x592   :  { %3777 = vmatpush3.msra.mxu1 %v5322_v23  ;;  %3741 = vmatprep.subr.mxu0 %v4393_v2 }
 0x593   :  { %3778 = vmatprep.subr.mxu1 %v4393_v2  ;;  %3742 = vmatpush3.msra.mxu0 %v4350_v34 }
 0x594   :  { %3779 = vmatpush3.msra.mxu1 %v5333_v27  ;;  %3743 = vmatprep.subr.mxu0 %v4393_v2 }
 0x595   :  { %3780 = vmatprep.subr.mxu1 %v4393_v2  ;;  %3744 = vmatpush3.msra.mxu0 %v4351_v45 }
 0x596   :  { %3781 = vmatpush3.msra.mxu1 %v5344_v30  ;;  %3745 = vmatprep.subr.mxu0 %v4393_v2 }
 0x597   :  { %3782 = vmatprep.subr.mxu1 %v4393_v2  ;;  %3746 = vmatpush3.msra.mxu0 %v4352_v49 }
 0x598   :  { %3783 = vmatpush3.msra.mxu1 %v5355_v35  ;;  %3747 = vmatprep.subr.mxu0 %v4393_v2 }
 0x599   :  { %3784 = vmatprep.subr.mxu1 %v4393_v2  ;;  %3748 = vmatpush3.msra.mxu0 %v4353_v55  ;;  %v5703_v55 = vld [vmem:[%s6194_s7] ss:$0 sm:$0xff] }
 0x59a   :  { %3785 = vmatpush3.msra.mxu1 %v5366_v47  ;;  %3749 = vmatprep.subr.mxu0 %v4393_v2 }
 0x59b   :  { %3786 = vmatprep.subr.mxu1 %v4393_v2  ;;  %3750 = vmatpush3.msra.mxu0 %v4354_v59  ;;  %v501_v59 = vadd.f32 %v5601_v50, %v4946_v32  ;;  %v645_v32 = vadd.f32 %v5601_v50, %v5018_v53  ;;  %v789_v53 = vadd.f32 %v5601_v50, %v5090_v4 }
 0x59c   :  { %3787 = vmatpush3.msra.mxu1 %v5377_v51  ;;  %3751 = vmatprep.subr.mxu0 %v4393_v2  ;;  %v933_v4 = vadd.f32 %v5601_v50, %v5187_v14  ;;  %v1077_v14 = vadd.f32 %v5601_v50, %v5281_v44  ;;  %v4363_v44 = vld [vmem:[%s6187_s3 + $0xf8] sm:$0xff] }
 0x59d   :  { %3788 = vmatprep.subr.mxu1 %v4393_v2  ;;  %3752 = vmatpush3.msra.mxu0 %v4355_v62 }
 0x59e   :  { %3789 = vmatpush3.msra.mxu1 %v5388_v58  ;;  %3753 = vmatprep.subr.mxu0 %v4393_v2 }
 0x59f   :  { %3790 = vmatprep.subr.mxu1 %v4393_v2  ;;  %3754 = vmatpush3.msra.mxu0 %v4356_v6 }
 0x5a0   :  { %3791 = vmatpush3.msra.mxu1 %v5399_v61  ;;  %3755 = vmatprep.subr.mxu0 %v4393_v2 }
 0x5a1   :  { %3792 = vmatprep.subr.mxu1 %v4393_v2  ;;  %3756 = vmatpush3.msra.mxu0 %v4357_v10 }
 0x5a2   :  { %3793 = vmatpush3.msra.mxu1 %v5410_v3  ;;  %3757 = vmatprep.subr.mxu0 %v4393_v2 }
 0x5a3   :  { %3794 = vmatprep.subr.mxu1 %v4393_v2  ;;  %3758 = vmatpush3.msra.mxu0 %v4358_v0 }
 0x5a4   :  { %3795 = vmatpush3.msra.mxu1 %v5421_v8  ;;  %3759 = vmatprep.subr.mxu0 %v4393_v2 }
 0x5a5   :  { %3796 = vmatprep.subr.mxu1 %v4393_v2  ;;  %3760 = vmatpush3.msra.mxu0 %v4359_v5 }
 0x5a6   :  { %3797 = vmatpush3.msra.mxu1 %v5432_v63  ;;  %3761 = vmatprep.subr.mxu0 %v4393_v2 }
 0x5a7   :  { %3798 = vmatprep.subr.mxu1 %v4393_v2  ;;  %3762 = vmatpush3.msra.mxu0 %v4360_v11 }
 0x5a8   :  { %3799 = vmatpush3.msra.mxu1 %v5443_v1  ;;  %3763 = vmatprep.subr.mxu0 %v4393_v2 }
 0x5a9   :  { %3801 = vmatmul.mubr.f32.vlgmr.msra.gmra.mxu1 %v2593_v7  ;;  %3764 = vmatpush3.msra.mxu0 %v4361_v17 }
 0x5aa   :  { %3765 = vmatprep.mubr.msk.f32.mxu0 %vm4394_vm0, %v4393_v2  ;;  %3803 = vmatprep.subr.mxu0 %v4393_v2 }
 0x5ab   :  { %3838 = vmatprep.subr.mxu1 %v4393_v2  ;;  %3870 = vmatprep.mubr.msk.f32.mxu1 %vm4394_vm0, %v4393_v2 }
 0x5ac   :  { %3839 = vmatpush3.msra.mxu1 %v5286_v56 }
 0x5ad   :  { %3840 = vmatprep.subr.mxu1 %v4393_v2 }
 0x5ae   :  { %3841 = vmatpush3.msra.mxu1 %v5291_v57 }
 0x5af   :  { %3842 = vmatprep.subr.mxu1 %v4393_v2 }
 0x5b0   :  { %3843 = vmatpush3.msra.mxu1 %v5300_v60 }
 0x5b1   :  { %3844 = vmatprep.subr.mxu1 %v4393_v2 }
 0x5b2   :  { %3845 = vmatpush3.msra.mxu1 %v5311_v15 }
 0x5b3   :  { %3846 = vmatprep.subr.mxu1 %v4393_v2 }
 0x5b4   :  { %3847 = vmatpush3.msra.mxu1 %v5322_v23 }
 0x5b5   :  { %3848 = vmatprep.subr.mxu1 %v4393_v2 }
 0x5b6   :  { %3849 = vmatpush3.msra.mxu1 %v5333_v27 }
 0x5b7   :  { %3850 = vmatprep.subr.mxu1 %v4393_v2 }
 0x5b8   :  { %3851 = vmatpush3.msra.mxu1 %v5344_v30 }
 0x5b9   :  { %3852 = vmatprep.subr.mxu1 %v4393_v2 }
 0x5ba   :  { %3853 = vmatpush3.msra.mxu1 %v5355_v35 }
 0x5bb   :  { %3854 = vmatprep.subr.mxu1 %v4393_v2 }
 0x5bc   :  { %3855 = vmatpush3.msra.mxu1 %v5366_v47 }
 0x5bd   :  { %3856 = vmatprep.subr.mxu1 %v4393_v2 }
 0x5be   :  { %3857 = vmatpush3.msra.mxu1 %v5377_v51 }
 0x5bf   :  { %3858 = vmatprep.subr.mxu1 %v4393_v2 }
 0x5c0   :  { %3859 = vmatpush3.msra.mxu1 %v5388_v58 }
 0x5c1   :  { %3860 = vmatprep.subr.mxu1 %v4393_v2 }
 0x5c2   :  { %3861 = vmatpush3.msra.mxu1 %v5399_v61 }
 0x5c3   :  { %3862 = vmatprep.subr.mxu1 %v4393_v2 }
 0x5c4   :  { %3863 = vmatpush3.msra.mxu1 %v5410_v3 }
 0x5c5   :  { %3864 = vmatprep.subr.mxu1 %v4393_v2 }
 0x5c6   :  { %3865 = vmatpush3.msra.mxu1 %v5421_v8 }
 0x5c7   :  { %3866 = vmatprep.subr.mxu1 %v4393_v2 }
 0x5c8   :  { %3867 = vmatpush3.msra.mxu1 %v5432_v63 }
 0x5c9   :  { %3868 = vmatprep.subr.mxu1 %v4393_v2 }
 0x5ca   :  { %3869 = vmatpush3.msra.mxu1 %v5443_v1 }
 0x5cb   :  { %3908 = vmatprep.subr.mxu1 %v4393_v2 }
 0x649   :  { %v5504_v18 = vpop.f32.mrf.mxu0  ;;  %v1292_v20 = vpop.f32.mrf.mxu1 }
 0x64a   :  { %v1296_v22 = vadd.f32 %v1292_v20, %v164_v16 }
 0x64b   :  { %v3697_v24 = vpop.f32.mrf.mxu0  ;;  %v3732_v26 = vpop.f32.mrf.mxu1 }
 0x64c   :  { %v1297_v28 = vmax.f32 %v1296_v22, 0.0 }
 0x64e   :  { %1369 = vst [vmem:[%s6193_s9] sm:$0xff] %v1297_v28  ;;  %3766 = vmatmul.mubr.f32.vlgmr.msra.gmra.mxu0 %v1297_v28 }
 0x64f   :  { %3804 = vmatpush3.msra.mxu0 %v5509_v31  ;;  %3835 = vmatprep.mubr.msk.f32.mxu0 %vm4394_vm0, %v4393_v2 }
 0x650   :  { %3805 = vmatprep.subr.mxu0 %v4393_v2 }
 0x651   :  { %3806 = vmatpush3.msra.mxu0 %v5517_v13 }
 0x652   :  { %3807 = vmatprep.subr.mxu0 %v4393_v2 }
 0x653   :  { %3808 = vmatpush3.msra.mxu0 %v5526_v33 }
 0x654   :  { %3809 = vmatprep.subr.mxu0 %v4393_v2 }
 0x655   :  { %3810 = vmatpush3.msra.mxu0 %v5533_v36 }
 0x656   :  { %3811 = vmatprep.subr.mxu0 %v4393_v2 }
 0x657   :  { %3812 = vmatpush3.msra.mxu0 %v5540_v37 }
 0x658   :  { %3813 = vmatprep.subr.mxu0 %v4393_v2 }
 0x659   :  { %3814 = vmatpush3.msra.mxu0 %v5547_v38 }
 0x65a   :  { %3815 = vmatprep.subr.mxu0 %v4393_v2 }
 0x65b   :  { %3816 = vmatpush3.msra.mxu0 %v5554_v39 }
 0x65c   :  { %3817 = vmatprep.subr.mxu0 %v4393_v2 }
 0x65d   :  { %3818 = vmatpush3.msra.mxu0 %v5561_v40 }
 0x65e   :  { %3819 = vmatprep.subr.mxu0 %v4393_v2 }
 0x65f   :  { %3820 = vmatpush3.msra.mxu0 %v5568_v41 }
 0x660   :  { %3821 = vmatprep.subr.mxu0 %v4393_v2 }
 0x661   :  { %3822 = vmatpush3.msra.mxu0 %v5575_v42 }
 0x662   :  { %3823 = vmatprep.subr.mxu0 %v4393_v2 }
 0x663   :  { %3824 = vmatpush3.msra.mxu0 %v5582_v43 }
 0x664   :  { %3825 = vmatprep.subr.mxu0 %v4393_v2 }
 0x665   :  { %3826 = vmatpush3.msra.mxu0 %v5589_v46 }
 0x666   :  { %3827 = vmatprep.subr.mxu0 %v4393_v2 }
 0x667   :  { %3828 = vmatpush3.msra.mxu0 %v5596_v48 }
 0x668   :  { %3829 = vmatprep.subr.mxu0 %v4393_v2 }
 0x669   :  { %v1473_v21 = vpop.f32.mrf.mxu1  ;;  %3830 = vmatpush3.msra.mxu0 %v5608_v52 }
 0x66a   :  { %v1477_v25 = vadd.f32 %v1473_v21, %v356_v54  ;;  %3831 = vmatprep.subr.mxu0 %v4393_v2 }
 0x66b   :  { %v3802_v34 = vpop.f32.mrf.mxu1  ;;  %3832 = vmatpush3.msra.mxu0 %v5617_v9 }
 0x66c   :  { %v1478_v19 = vmax.f32 %v1477_v25, 0.0  ;;  %3833 = vmatprep.subr.mxu0 %v4393_v2 }
 0x66d   :  { %3834 = vmatpush3.msra.mxu0 %v5624_v29 }
 0x66e   :  { %3836 = vmatmul.mubr.f32.vlgmr.msra.gmra.mxu0 %v1478_v19  ;;  %3871 = vmatmul.mubr.f32.vlgmr.msra.gmra.mxu1 %v1478_v19 }
 0x66f   :  { %3873 = vmatprep.subr.mxu0 %v4393_v2  ;;  %3909 = vmatpush3.msra.mxu1 %v5286_v56 }
 0x670   :  { %3874 = vmatpush3.msra.mxu0 %v5509_v31  ;;  %3910 = vmatprep.subr.mxu1 %v4393_v2 }
 0x671   :  { %3875 = vmatprep.subr.mxu0 %v4393_v2  ;;  %3911 = vmatpush3.msra.mxu1 %v5291_v57 }
 0x672   :  { %3876 = vmatpush3.msra.mxu0 %v5517_v13  ;;  %3912 = vmatprep.subr.mxu1 %v4393_v2 }
 0x673   :  { %3877 = vmatprep.subr.mxu0 %v4393_v2  ;;  %3913 = vmatpush3.msra.mxu1 %v5300_v60 }
 0x674   :  { %3878 = vmatpush3.msra.mxu0 %v5526_v33  ;;  %3914 = vmatprep.subr.mxu1 %v4393_v2 }
 0x675   :  { %3879 = vmatprep.subr.mxu0 %v4393_v2  ;;  %3915 = vmatpush3.msra.mxu1 %v5311_v15 }
 0x676   :  { %3880 = vmatpush3.msra.mxu0 %v5533_v36  ;;  %3916 = vmatprep.subr.mxu1 %v4393_v2 }
 0x677   :  { %3881 = vmatprep.subr.mxu0 %v4393_v2  ;;  %3917 = vmatpush3.msra.mxu1 %v5322_v23 }
 0x678   :  { %3882 = vmatpush3.msra.mxu0 %v5540_v37  ;;  %3918 = vmatprep.subr.mxu1 %v4393_v2 }
 0x679   :  { %3883 = vmatprep.subr.mxu0 %v4393_v2  ;;  %3919 = vmatpush3.msra.mxu1 %v5333_v27 }
 0x67a   :  { %3884 = vmatpush3.msra.mxu0 %v5547_v38  ;;  %3920 = vmatprep.subr.mxu1 %v4393_v2 }
 0x67b   :  { %3885 = vmatprep.subr.mxu0 %v4393_v2  ;;  %3921 = vmatpush3.msra.mxu1 %v5344_v30 }
 0x67c   :  { %3886 = vmatpush3.msra.mxu0 %v5554_v39  ;;  %3922 = vmatprep.subr.mxu1 %v4393_v2 }
 0x67d   :  { %3887 = vmatprep.subr.mxu0 %v4393_v2  ;;  %3923 = vmatpush3.msra.mxu1 %v5355_v35 }
 0x67e   :  { %3888 = vmatpush3.msra.mxu0 %v5561_v40  ;;  %3924 = vmatprep.subr.mxu1 %v4393_v2 }
 0x67f   :  { %3889 = vmatprep.subr.mxu0 %v4393_v2  ;;  %3925 = vmatpush3.msra.mxu1 %v5366_v47 }
 0x680   :  { %3890 = vmatpush3.msra.mxu0 %v5568_v41  ;;  %3926 = vmatprep.subr.mxu1 %v4393_v2 }
 0x681   :  { %3891 = vmatprep.subr.mxu0 %v4393_v2  ;;  %3927 = vmatpush3.msra.mxu1 %v5377_v51 }
 0x682   :  { %3892 = vmatpush3.msra.mxu0 %v5575_v42  ;;  %3928 = vmatprep.subr.mxu1 %v4393_v2 }
 0x683   :  { %3893 = vmatprep.subr.mxu0 %v4393_v2  ;;  %3929 = vmatpush3.msra.mxu1 %v5388_v58 }
 0x684   :  { %3894 = vmatpush3.msra.mxu0 %v5582_v43  ;;  %3930 = vmatprep.subr.mxu1 %v4393_v2 }
 0x685   :  { %3895 = vmatprep.subr.mxu0 %v4393_v2  ;;  %3931 = vmatpush3.msra.mxu1 %v5399_v61 }
 0x686   :  { %3896 = vmatpush3.msra.mxu0 %v5589_v46  ;;  %3932 = vmatprep.subr.mxu1 %v4393_v2 }
 0x687   :  { %3897 = vmatprep.subr.mxu0 %v4393_v2  ;;  %3933 = vmatpush3.msra.mxu1 %v5410_v3 }
 0x688   :  { %3898 = vmatpush3.msra.mxu0 %v5596_v48  ;;  %3934 = vmatprep.subr.mxu1 %v4393_v2 }
 0x689   :  { %3899 = vmatprep.subr.mxu0 %v4393_v2  ;;  %3935 = vmatpush3.msra.mxu1 %v5421_v8 }
 0x68a   :  { %3900 = vmatpush3.msra.mxu0 %v5608_v52  ;;  %3936 = vmatprep.subr.mxu1 %v4393_v2 }
 0x68b   :  { %3901 = vmatprep.subr.mxu0 %v4393_v2  ;;  %3937 = vmatpush3.msra.mxu1 %v5432_v63 }
 0x68c   :  { %3902 = vmatpush3.msra.mxu0 %v5617_v9  ;;  %3938 = vmatprep.subr.mxu1 %v4393_v2 }
 0x68d   :  { %3903 = vmatprep.subr.mxu0 %v4393_v2  ;;  %3905 = vmatprep.mubr.msk.f32.mxu0 %vm4394_vm0, %v4393_v2 }
 0x68e   :  { %3904 = vmatpush3.msra.mxu0 %v5624_v29  ;;  %3939 = vmatpush3.msra.mxu1 %v5443_v1 }
 0x68f   :  { %3940 = vmatprep.mubr.msk.f32.mxu1 %vm4394_vm0, %v4393_v2  ;;  %3943 = vmatprep.subr.mxu0 %v4393_v2 }
 0x690   :  { %3978 = vmatprep.subr.mxu1 %v4393_v2 }
 0x70e   :  { %v5698_v45 = vpop.f32.mrf.mxu0 }
 0x710   :  { %v3767_v49 = vpop.f32.mrf.mxu0 }
 0x72e   :  { %v1551_v62 = vpop.f32.mrf.mxu0  ;;  %v1623_v6 = vpop.f32.mrf.mxu1 }
 0x72f   :  { %v1552_v10 = vadd.f32 %v5703_v55, %v1551_v62  ;;  %v1627_v0 = vadd.f32 %v1623_v6, %v501_v59 }
 0x730   :  { %v3837_v5 = vpop.f32.mrf.mxu0  ;;  %v3872_v7 = vpop.f32.mrf.mxu1 }
 0x731   :  { %1555 = vst [vmem:[%s6195_s8] sm:$0xff] %v1552_v10  ;;  %v1628_v11 = vmax.f32 %v1627_v0, 0.0 }
 0x733   :  { %3906 = vmatmul.mubr.f32.vlgmr.msra.gmra.mxu0 %v1628_v11  ;;  %3941 = vmatmul.mubr.f32.vlgmr.msra.gmra.mxu1 %v1628_v11 }
 0x734   :  { %3944 = vmatpush3.msra.mxu0 %v5509_v31  ;;  %3979 = vmatpush3.msra.mxu1 %v5286_v56 }
 0x735   :  { %3945 = vmatprep.subr.mxu0 %v4393_v2  ;;  %3980 = vmatprep.subr.mxu1 %v4393_v2 }
 0x736   :  { %3946 = vmatpush3.msra.mxu0 %v5517_v13  ;;  %3981 = vmatpush3.msra.mxu1 %v5291_v57 }
 0x737   :  { %3947 = vmatprep.subr.mxu0 %v4393_v2  ;;  %3982 = vmatprep.subr.mxu1 %v4393_v2 }
 0x738   :  { %3948 = vmatpush3.msra.mxu0 %v5526_v33  ;;  %3983 = vmatpush3.msra.mxu1 %v5300_v60 }
 0x739   :  { %3949 = vmatprep.subr.mxu0 %v4393_v2  ;;  %3984 = vmatprep.subr.mxu1 %v4393_v2 }
 0x73a   :  { %3950 = vmatpush3.msra.mxu0 %v5533_v36  ;;  %3985 = vmatpush3.msra.mxu1 %v5311_v15 }
 0x73b   :  { %3951 = vmatprep.subr.mxu0 %v4393_v2  ;;  %3986 = vmatprep.subr.mxu1 %v4393_v2 }
 0x73c   :  { %3952 = vmatpush3.msra.mxu0 %v5540_v37  ;;  %3987 = vmatpush3.msra.mxu1 %v5322_v23 }
 0x73d   :  { %3953 = vmatprep.subr.mxu0 %v4393_v2  ;;  %3988 = vmatprep.subr.mxu1 %v4393_v2 }
 0x73e   :  { %3954 = vmatpush3.msra.mxu0 %v5547_v38  ;;  %3989 = vmatpush3.msra.mxu1 %v5333_v27 }
 0x73f   :  { %3955 = vmatprep.subr.mxu0 %v4393_v2  ;;  %3990 = vmatprep.subr.mxu1 %v4393_v2 }
 0x740   :  { %3956 = vmatpush3.msra.mxu0 %v5554_v39  ;;  %3991 = vmatpush3.msra.mxu1 %v5344_v30 }
 0x741   :  { %3957 = vmatprep.subr.mxu0 %v4393_v2  ;;  %3992 = vmatprep.subr.mxu1 %v4393_v2 }
 0x742   :  { %3958 = vmatpush3.msra.mxu0 %v5561_v40  ;;  %3993 = vmatpush3.msra.mxu1 %v5355_v35 }
 0x743   :  { %3959 = vmatprep.subr.mxu0 %v4393_v2  ;;  %3994 = vmatprep.subr.mxu1 %v4393_v2 }
 0x744   :  { %3960 = vmatpush3.msra.mxu0 %v5568_v41  ;;  %3995 = vmatpush3.msra.mxu1 %v5366_v47 }
 0x745   :  { %3961 = vmatprep.subr.mxu0 %v4393_v2  ;;  %3996 = vmatprep.subr.mxu1 %v4393_v2 }
 0x746   :  { %3962 = vmatpush3.msra.mxu0 %v5575_v42  ;;  %3997 = vmatpush3.msra.mxu1 %v5377_v51 }
 0x747   :  { %3963 = vmatprep.subr.mxu0 %v4393_v2  ;;  %3998 = vmatprep.subr.mxu1 %v4393_v2 }
 0x748   :  { %3964 = vmatpush3.msra.mxu0 %v5582_v43  ;;  %3999 = vmatpush3.msra.mxu1 %v5388_v58 }
 0x749   :  { %3965 = vmatprep.subr.mxu0 %v4393_v2  ;;  %4000 = vmatprep.subr.mxu1 %v4393_v2 }
 0x74a   :  { %3966 = vmatpush3.msra.mxu0 %v5589_v46  ;;  %4001 = vmatpush3.msra.mxu1 %v5399_v61 }
 0x74b   :  { %3967 = vmatprep.subr.mxu0 %v4393_v2  ;;  %4002 = vmatprep.subr.mxu1 %v4393_v2 }
 0x74c   :  { %3968 = vmatpush3.msra.mxu0 %v5596_v48  ;;  %4003 = vmatpush3.msra.mxu1 %v5410_v3 }
 0x74d   :  { %3969 = vmatprep.subr.mxu0 %v4393_v2  ;;  %4004 = vmatprep.subr.mxu1 %v4393_v2 }
 0x74e   :  { %3970 = vmatpush3.msra.mxu0 %v5608_v52  ;;  %4005 = vmatpush3.msra.mxu1 %v5421_v8 }
 0x74f   :  { %3971 = vmatprep.subr.mxu0 %v4393_v2  ;;  %4006 = vmatprep.subr.mxu1 %v4393_v2 }
 0x750   :  { %3972 = vmatpush3.msra.mxu0 %v5617_v9  ;;  %4007 = vmatpush3.msra.mxu1 %v5432_v63 }
 0x751   :  { %3973 = vmatprep.subr.mxu0 %v4393_v2  ;;  %4008 = vmatprep.subr.mxu1 %v4393_v2 }
 0x752   :  { %3974 = vmatpush3.msra.mxu0 %v5624_v29  ;;  %3975 = vmatprep.mubr.msk.f32.mxu0 %vm4394_vm0, %v4393_v2 }
 0x753   :  { %4009 = vmatpush3.msra.mxu1 %v5443_v1  ;;  %4010 = vmatprep.mubr.msk.f32.mxu1 %vm4394_vm0, %v4393_v2 }
 0x754   :  { %4013 = vmatprep.subr.mxu0 %v4393_v2  ;;  %4048 = vmatprep.subr.mxu1 %v4393_v2 }
 0x7f3   :  { %v1695_v17 = vpop.f32.mrf.mxu0  ;;  %v1767_v12 = vpop.f32.mrf.mxu1 }
 0x7f4   :  { %v1696_v16 = vadd.f32 %v5703_v55, %v1695_v17  ;;  %v1771_v20 = vadd.f32 %v1767_v12, %v645_v32  ;;  %v4379_v32 = vld [vmem:[%s6192_s6 + $0x78] sm:$0xff]  ;;  %v4382_v17 = vld [vmem:[%s6192_s6 + $0x60] sm:$0xff] }
 0x7f5   :  { %v3907_v22 = vpop.f32.mrf.mxu0  ;;  %v3942_v24 = vpop.f32.mrf.mxu1  ;;  %v4383_v12 = vld [vmem:[%s6192_s6 + $0x58] sm:$0xff] }
 0x7f6   :  { %1699 = vst [vmem:[%s6195_s8 + $0x8] sm:$0xff] %v1696_v16  ;;  %v1772_v26 = vmax.f32 %v1771_v20, 0.0  ;;  %v4384_v16 = vld [vmem:[%s6192_s6 + $0x50] sm:$0xff]  ;;  %v4385_v20 = vld [vmem:[%s6192_s6 + $0x48] sm:$0xff]  ;;  %v4386_v22 = vld [vmem:[%s6192_s6 + $0x40] sm:$0xff] }
 0x7f7   :  { %v4387_v24 = vld [vmem:[%s6192_s6 + $0x38] sm:$0xff] }
 0x7f8   :  { %3976 = vmatmul.mubr.f32.vlgmr.msra.gmra.mxu0 %v1772_v26  ;;  %4011 = vmatmul.mubr.f32.vlgmr.msra.gmra.mxu1 %v1772_v26  ;;  %v4388_v26 = vld [vmem:[%s6192_s6 + $0x30] sm:$0xff] }
 0x7f9   :  { %4014 = vmatpush3.msra.mxu0 %v5509_v31  ;;  %4049 = vmatpush3.msra.mxu1 %v5286_v56 }
 0x7fa   :  { %4015 = vmatprep.subr.mxu0 %v4393_v2  ;;  %4050 = vmatprep.subr.mxu1 %v4393_v2 }
 0x7fb   :  { %4016 = vmatpush3.msra.mxu0 %v5517_v13  ;;  %4051 = vmatpush3.msra.mxu1 %v5291_v57 }
 0x7fc   :  { %4017 = vmatprep.subr.mxu0 %v4393_v2  ;;  %4052 = vmatprep.subr.mxu1 %v4393_v2 }
 0x7fd   :  { %4018 = vmatpush3.msra.mxu0 %v5526_v33  ;;  %4053 = vmatpush3.msra.mxu1 %v5300_v60 }
 0x7fe   :  { %4019 = vmatprep.subr.mxu0 %v4393_v2  ;;  %4054 = vmatprep.subr.mxu1 %v4393_v2 }
 0x7ff   :  { %4020 = vmatpush3.msra.mxu0 %v5533_v36  ;;  %4055 = vmatpush3.msra.mxu1 %v5311_v15 }
 0x800   :  { %4021 = vmatprep.subr.mxu0 %v4393_v2  ;;  %4056 = vmatprep.subr.mxu1 %v4393_v2 }
 0x801   :  { %4022 = vmatpush3.msra.mxu0 %v5540_v37  ;;  %4057 = vmatpush3.msra.mxu1 %v5322_v23 }
 0x802   :  { %4023 = vmatprep.subr.mxu0 %v4393_v2  ;;  %4058 = vmatprep.subr.mxu1 %v4393_v2 }
 0x803   :  { %4024 = vmatpush3.msra.mxu0 %v5547_v38  ;;  %4059 = vmatpush3.msra.mxu1 %v5333_v27 }
 0x804   :  { %4025 = vmatprep.subr.mxu0 %v4393_v2  ;;  %4060 = vmatprep.subr.mxu1 %v4393_v2 }
 0x805   :  { %4026 = vmatpush3.msra.mxu0 %v5554_v39  ;;  %4061 = vmatpush3.msra.mxu1 %v5344_v30 }
 0x806   :  { %4027 = vmatprep.subr.mxu0 %v4393_v2  ;;  %4062 = vmatprep.subr.mxu1 %v4393_v2 }
 0x807   :  { %4028 = vmatpush3.msra.mxu0 %v5561_v40  ;;  %4063 = vmatpush3.msra.mxu1 %v5355_v35 }
 0x808   :  { %4029 = vmatprep.subr.mxu0 %v4393_v2  ;;  %4064 = vmatprep.subr.mxu1 %v4393_v2 }
 0x809   :  { %4030 = vmatpush3.msra.mxu0 %v5568_v41  ;;  %4065 = vmatpush3.msra.mxu1 %v5366_v47 }
 0x80a   :  { %4031 = vmatprep.subr.mxu0 %v4393_v2  ;;  %4066 = vmatprep.subr.mxu1 %v4393_v2 }
 0x80b   :  { %4032 = vmatpush3.msra.mxu0 %v5575_v42  ;;  %4067 = vmatpush3.msra.mxu1 %v5377_v51 }
 0x80c   :  { %4033 = vmatprep.subr.mxu0 %v4393_v2  ;;  %4068 = vmatprep.subr.mxu1 %v4393_v2 }
 0x80d   :  { %4034 = vmatpush3.msra.mxu0 %v5582_v43  ;;  %4069 = vmatpush3.msra.mxu1 %v5388_v58 }
 0x80e   :  { %4035 = vmatprep.subr.mxu0 %v4393_v2  ;;  %4070 = vmatprep.subr.mxu1 %v4393_v2 }
 0x80f   :  { %4036 = vmatpush3.msra.mxu0 %v5589_v46  ;;  %4071 = vmatpush3.msra.mxu1 %v5399_v61 }
 0x810   :  { %4037 = vmatprep.subr.mxu0 %v4393_v2  ;;  %4072 = vmatprep.subr.mxu1 %v4393_v2 }
 0x811   :  { %4038 = vmatpush3.msra.mxu0 %v5596_v48  ;;  %4073 = vmatpush3.msra.mxu1 %v5410_v3 }
 0x812   :  { %4039 = vmatprep.subr.mxu0 %v4393_v2  ;;  %4074 = vmatprep.subr.mxu1 %v4393_v2 }
 0x813   :  { %4040 = vmatpush3.msra.mxu0 %v5608_v52  ;;  %4075 = vmatpush3.msra.mxu1 %v5421_v8 }
 0x814   :  { %4041 = vmatprep.subr.mxu0 %v4393_v2  ;;  %4076 = vmatprep.subr.mxu1 %v4393_v2 }
 0x815   :  { %4042 = vmatpush3.msra.mxu0 %v5617_v9  ;;  %4077 = vmatpush3.msra.mxu1 %v5432_v63 }
 0x816   :  { %4043 = vmatprep.subr.mxu0 %v4393_v2  ;;  %4078 = vmatprep.subr.mxu1 %v4393_v2 }
 0x817   :  { %4044 = vmatpush3.msra.mxu0 %v5624_v29  ;;  %4045 = vmatprep.mubr.msk.f32.mxu0 %vm4394_vm0, %v4393_v2 }
 0x818   :  { %4079 = vmatpush3.msra.mxu1 %v5443_v1  ;;  %4080 = vmatprep.mubr.msk.f32.mxu1 %vm4394_vm0, %v4393_v2 }
 0x819   :  { %4083 = vmatprep.subr.mxu0 %v4393_v2  ;;  %4118 = vmatprep.subr.mxu1 %v4393_v2 }
 0x8b8   :  { %v1839_v28 = vpop.f32.mrf.mxu0  ;;  %v1911_v54 = vpop.f32.mrf.mxu1 }
 0x8b9   :  { %v1840_v21 = vadd.f32 %v5703_v55, %v1839_v28  ;;  %v1915_v25 = vadd.f32 %v1911_v54, %v789_v53  ;;  %v4389_v53 = vld [vmem:[%s6192_s6 + $0x28] sm:$0xff]  ;;  %v4390_v28 = vld [vmem:[%s6192_s6 + $0x20] sm:$0xff]  ;;  %v4391_v54 = vld [vmem:[%s6192_s6 + $0x18] sm:$0xff] }
 0x8ba   :  { %v3977_v34 = vpop.f32.mrf.mxu0  ;;  %v4012_v19 = vpop.f32.mrf.mxu1 }
 0x8bb   :  { %1843 = vst [vmem:[%s6195_s8 + $0x10] sm:$0xff] %v1840_v21  ;;  %v1916_v49 = vmax.f32 %v1915_v25, 0.0  ;;  %v4392_v21 = vld [vmem:[%s6191_s4 + $0x1] ss:$0 sm:$0xff] }
 0x8bc   :  { %v1365_v25 = vadd.f32 %v4392_v21, %v5698_v45 }
 0x8bd   :  { %4046 = vmatmul.mubr.f32.vlgmr.msra.gmra.mxu0 %v1916_v49  ;;  %4081 = vmatmul.mubr.f32.vlgmr.msra.gmra.mxu1 %v1916_v49 }
 0x8be   :  { %4084 = vmatpush3.msra.mxu0 %v5509_v31  ;;  %4119 = vmatpush3.msra.mxu1 %v5286_v56 }
 0x8bf   :  { %4085 = vmatprep.subr.mxu0 %v4393_v2  ;;  %4120 = vmatprep.subr.mxu1 %v4393_v2 }
 0x8c0   :  { %4086 = vmatpush3.msra.mxu0 %v5517_v13  ;;  %4121 = vmatpush3.msra.mxu1 %v5291_v57 }
 0x8c1   :  { %4087 = vmatprep.subr.mxu0 %v4393_v2  ;;  %4122 = vmatprep.subr.mxu1 %v4393_v2 }
 0x8c2   :  { %4088 = vmatpush3.msra.mxu0 %v5526_v33  ;;  %4123 = vmatpush3.msra.mxu1 %v5300_v60 }
 0x8c3   :  { %4089 = vmatprep.subr.mxu0 %v4393_v2  ;;  %4124 = vmatprep.subr.mxu1 %v4393_v2 }
 0x8c4   :  { %4090 = vmatpush3.msra.mxu0 %v5533_v36  ;;  %4125 = vmatpush3.msra.mxu1 %v5311_v15 }
 0x8c5   :  { %4091 = vmatprep.subr.mxu0 %v4393_v2  ;;  %4126 = vmatprep.subr.mxu1 %v4393_v2 }
 0x8c6   :  { %4092 = vmatpush3.msra.mxu0 %v5540_v37  ;;  %4127 = vmatpush3.msra.mxu1 %v5322_v23 }
 0x8c7   :  { %4093 = vmatprep.subr.mxu0 %v4393_v2  ;;  %4128 = vmatprep.subr.mxu1 %v4393_v2 }
 0x8c8   :  { %4094 = vmatpush3.msra.mxu0 %v5547_v38  ;;  %4129 = vmatpush3.msra.mxu1 %v5333_v27 }
 0x8c9   :  { %4095 = vmatprep.subr.mxu0 %v4393_v2  ;;  %4130 = vmatprep.subr.mxu1 %v4393_v2 }
 0x8ca   :  { %4096 = vmatpush3.msra.mxu0 %v5554_v39  ;;  %4131 = vmatpush3.msra.mxu1 %v5344_v30 }
 0x8cb   :  { %4097 = vmatprep.subr.mxu0 %v4393_v2  ;;  %4132 = vmatprep.subr.mxu1 %v4393_v2 }
 0x8cc   :  { %4098 = vmatpush3.msra.mxu0 %v5561_v40  ;;  %4133 = vmatpush3.msra.mxu1 %v5355_v35 }
 0x8cd   :  { %4099 = vmatprep.subr.mxu0 %v4393_v2  ;;  %4134 = vmatprep.subr.mxu1 %v4393_v2 }
 0x8ce   :  { %4100 = vmatpush3.msra.mxu0 %v5568_v41  ;;  %4135 = vmatpush3.msra.mxu1 %v5366_v47 }
 0x8cf   :  { %4101 = vmatprep.subr.mxu0 %v4393_v2  ;;  %4136 = vmatprep.subr.mxu1 %v4393_v2 }
 0x8d0   :  { %4102 = vmatpush3.msra.mxu0 %v5575_v42  ;;  %4137 = vmatpush3.msra.mxu1 %v5377_v51 }
 0x8d1   :  { %4103 = vmatprep.subr.mxu0 %v4393_v2  ;;  %4138 = vmatprep.subr.mxu1 %v4393_v2 }
 0x8d2   :  { %4104 = vmatpush3.msra.mxu0 %v5582_v43  ;;  %4139 = vmatpush3.msra.mxu1 %v5388_v58 }
 0x8d3   :  { %4105 = vmatprep.subr.mxu0 %v4393_v2  ;;  %4140 = vmatprep.subr.mxu1 %v4393_v2 }
 0x8d4   :  { %4106 = vmatpush3.msra.mxu0 %v5589_v46  ;;  %4141 = vmatpush3.msra.mxu1 %v5399_v61 }
 0x8d5   :  { %4107 = vmatprep.subr.mxu0 %v4393_v2  ;;  %4142 = vmatprep.subr.mxu1 %v4393_v2 }
 0x8d6   :  { %4108 = vmatpush3.msra.mxu0 %v5596_v48  ;;  %4143 = vmatpush3.msra.mxu1 %v5410_v3 }
 0x8d7   :  { %4109 = vmatprep.subr.mxu0 %v4393_v2  ;;  %4144 = vmatprep.subr.mxu1 %v4393_v2 }
 0x8d8   :  { %4110 = vmatpush3.msra.mxu0 %v5608_v52  ;;  %4145 = vmatpush3.msra.mxu1 %v5421_v8 }
 0x8d9   :  { %4111 = vmatprep.subr.mxu0 %v4393_v2  ;;  %4146 = vmatprep.subr.mxu1 %v4393_v2 }
 0x8da   :  { %4112 = vmatpush3.msra.mxu0 %v5617_v9  ;;  %4147 = vmatpush3.msra.mxu1 %v5432_v63 }
 0x8db   :  { %4113 = vmatprep.subr.mxu0 %v4393_v2  ;;  %4148 = vmatprep.subr.mxu1 %v4393_v2 }
 0x8dc   :  { %4114 = vmatpush3.msra.mxu0 %v5624_v29  ;;  %4115 = vmatprep.mubr.msk.f32.mxu0 %vm4394_vm0, %v4393_v2 }
 0x8dd   :  { %4149 = vmatpush3.msra.mxu1 %v5443_v1  ;;  %4150 = vmatprep.mubr.msk.f32.mxu1 %vm4394_vm0, %v4393_v2 }
 0x8de   :  { %4153 = vmatprep.subr.mxu0 %v4393_v2  ;;  %4188 = vmatprep.subr.mxu1 %v4393_v2 }
 0x97d   :  { %v1983_v59 = vpop.f32.mrf.mxu0  ;;  %v2055_v62 = vpop.f32.mrf.mxu1 }
 0x97e   :  { %v1984_v6 = vadd.f32 %v5703_v55, %v1983_v59  ;;  %v2059_v10 = vadd.f32 %v2055_v62, %v933_v4 }
 0x97f   :  { %v4047_v0 = vpop.f32.mrf.mxu0  ;;  %v4082_v5 = vpop.f32.mrf.mxu1 }
 0x980   :  { %1987 = vst [vmem:[%s6195_s8 + $0x18] sm:$0xff] %v1984_v6  ;;  %v2060_v7 = vmax.f32 %v2059_v10, 0.0 }
 0x982   :  { %4116 = vmatmul.mubr.f32.vlgmr.msra.gmra.mxu0 %v2060_v7  ;;  %4151 = vmatmul.mubr.f32.vlgmr.msra.gmra.mxu1 %v2060_v7 }
 0x983   :  { %4154 = vmatpush3.msra.mxu0 %v5509_v31  ;;  %4189 = vmatpush3.msra.mxu1 %v5286_v56 }
 0x984   :  { %4155 = vmatprep.subr.mxu0 %v4393_v2  ;;  %4190 = vmatprep.subr.mxu1 %v4393_v2 }
 0x985   :  { %4156 = vmatpush3.msra.mxu0 %v5517_v13  ;;  %4191 = vmatpush3.msra.mxu1 %v5291_v57 }
 0x986   :  { %4157 = vmatprep.subr.mxu0 %v4393_v2  ;;  %4192 = vmatprep.subr.mxu1 %v4393_v2 }
 0x987   :  { %4158 = vmatpush3.msra.mxu0 %v5526_v33  ;;  %4193 = vmatpush3.msra.mxu1 %v5300_v60 }
 0x988   :  { %4159 = vmatprep.subr.mxu0 %v4393_v2  ;;  %4194 = vmatprep.subr.mxu1 %v4393_v2 }
 0x989   :  { %4160 = vmatpush3.msra.mxu0 %v5533_v36  ;;  %4195 = vmatpush3.msra.mxu1 %v5311_v15 }
 0x98a   :  { %4161 = vmatprep.subr.mxu0 %v4393_v2  ;;  %4196 = vmatprep.subr.mxu1 %v4393_v2 }
 0x98b   :  { %4162 = vmatpush3.msra.mxu0 %v5540_v37  ;;  %4197 = vmatpush3.msra.mxu1 %v5322_v23 }
 0x98c   :  { %4163 = vmatprep.subr.mxu0 %v4393_v2  ;;  %4198 = vmatprep.subr.mxu1 %v4393_v2 }
 0x98d   :  { %4164 = vmatpush3.msra.mxu0 %v5547_v38  ;;  %4199 = vmatpush3.msra.mxu1 %v5333_v27 }
 0x98e   :  { %4165 = vmatprep.subr.mxu0 %v4393_v2  ;;  %4200 = vmatprep.subr.mxu1 %v4393_v2 }
 0x98f   :  { %4166 = vmatpush3.msra.mxu0 %v5554_v39  ;;  %4201 = vmatpush3.msra.mxu1 %v5344_v30 }
 0x990   :  { %4167 = vmatprep.subr.mxu0 %v4393_v2  ;;  %4202 = vmatprep.subr.mxu1 %v4393_v2 }
 0x991   :  { %4168 = vmatpush3.msra.mxu0 %v5561_v40  ;;  %4203 = vmatpush3.msra.mxu1 %v5355_v35  ;;  %v4364_v35 = vld [vmem:[%s6187_s3 + $0xf0] sm:$0xff] }
 0x992   :  { %4169 = vmatprep.subr.mxu0 %v4393_v2  ;;  %4204 = vmatprep.subr.mxu1 %v4393_v2 }
 0x993   :  { %4170 = vmatpush3.msra.mxu0 %v5568_v41  ;;  %4205 = vmatpush3.msra.mxu1 %v5366_v47  ;;  %v4365_v47 = vld [vmem:[%s6187_s3 + $0xe8] sm:$0xff] }
 0x994   :  { %4171 = vmatprep.subr.mxu0 %v4393_v2  ;;  %4206 = vmatprep.subr.mxu1 %v4393_v2 }
 0x995   :  { %4172 = vmatpush3.msra.mxu0 %v5575_v42  ;;  %4207 = vmatpush3.msra.mxu1 %v5377_v51  ;;  %v4366_v51 = vld [vmem:[%s6187_s3 + $0xe0] sm:$0xff] }
 0x996   :  { %4173 = vmatprep.subr.mxu0 %v4393_v2  ;;  %4208 = vmatprep.subr.mxu1 %v4393_v2 }
 0x997   :  { %4174 = vmatpush3.msra.mxu0 %v5582_v43  ;;  %4209 = vmatpush3.msra.mxu1 %v5388_v58  ;;  %v4367_v58 = vld [vmem:[%s6187_s3 + $0xd8] sm:$0xff] }
 0x998   :  { %4175 = vmatprep.subr.mxu0 %v4393_v2  ;;  %4210 = vmatprep.subr.mxu1 %v4393_v2 }
 0x999   :  { %4176 = vmatpush3.msra.mxu0 %v5589_v46  ;;  %4211 = vmatpush3.msra.mxu1 %v5399_v61  ;;  %v4368_v61 = vld [vmem:[%s6187_s3 + $0xd0] sm:$0xff] }
 0x99a   :  { %4177 = vmatprep.subr.mxu0 %v4393_v2  ;;  %4212 = vmatprep.subr.mxu1 %v4393_v2 }
 0x99b   :  { %4178 = vmatpush3.msra.mxu0 %v5596_v48  ;;  %4213 = vmatpush3.msra.mxu1 %v5410_v3  ;;  %v4369_v3 = vld [vmem:[%s6187_s3 + $0xc8] sm:$0xff] }
 0x99c   :  { %4179 = vmatprep.subr.mxu0 %v4393_v2  ;;  %4214 = vmatprep.subr.mxu1 %v4393_v2 }
 0x99d   :  { %4180 = vmatpush3.msra.mxu0 %v5608_v52  ;;  %4215 = vmatpush3.msra.mxu1 %v5421_v8  ;;  %v4370_v8 = vld [vmem:[%s6187_s3 + $0xc0] sm:$0xff] }
 0x99e   :  { %4181 = vmatprep.subr.mxu0 %v4393_v2  ;;  %4216 = vmatprep.subr.mxu1 %v4393_v2 }
 0x99f   :  { %4182 = vmatpush3.msra.mxu0 %v5617_v9  ;;  %4217 = vmatpush3.msra.mxu1 %v5432_v63  ;;  %v4371_v63 = vld [vmem:[%s6187_s3 + $0xb8] sm:$0xff] }
 0x9a0   :  { %4183 = vmatprep.subr.mxu0 %v4393_v2  ;;  %4218 = vmatprep.subr.mxu1 %v4393_v2 }
 0x9a1   :  { %4184 = vmatpush3.msra.mxu0 %v5624_v29  ;;  %4185 = vmatprep.mubr.msk.f32.mxu0 %vm4394_vm0, %v4393_v2 }
 0x9a2   :  { %4219 = vmatpush3.msra.mxu1 %v5443_v1  ;;  %4220 = vmatprep.mubr.msk.f32.mxu1 %vm4394_vm0, %v4393_v2  ;;  %v4372_v1 = vld [vmem:[%s6187_s3 + $0xb0] sm:$0xff] }
 0x9a3   :  { %4223 = vmatprep.subr.mxu0 %v4393_v2  ;;  %4258 = vmatprep.subr.mxu1 %v4393_v2 }
 0xa42   :  { %v2127_v56 = vpop.f32.mrf.mxu0  ;;  %v2199_v57 = vpop.f32.mrf.mxu1 }
 0xa43   :  { %v2128_v60 = vadd.f32 %v5703_v55, %v2127_v56  ;;  %v2203_v15 = vadd.f32 %v2199_v57, %v1077_v14 }
 0xa44   :  { %v4117_v23 = vpop.f32.mrf.mxu0  ;;  %v4152_v27 = vpop.f32.mrf.mxu1 }
 0xa45   :  { %2131 = vst [vmem:[%s6195_s8 + $0x20] sm:$0xff] %v2128_v60  ;;  %v2204_v30 = vmax.f32 %v2203_v15, 0.0 }
 0xa47   :  { %4186 = vmatmul.mubr.f32.vlgmr.msra.gmra.mxu0 %v2204_v30  ;;  %4221 = vmatmul.mubr.f32.vlgmr.msra.gmra.mxu1 %v2204_v30 }
 0xa48   :  { %4224 = vmatpush3.msra.mxu0 %v5509_v31  ;;  %4259 = vmatpush3.msra.mxu1 %v4363_v44  ;;  %v4373_v31 = vld [vmem:[%s6187_s3 + $0xa8] sm:$0xff] }
 0xa49   :  { %4225 = vmatprep.subr.mxu0 %v4393_v2  ;;  %4260 = vmatprep.subr.mxu1 %v4393_v2 }
 0xa4a   :  { %4226 = vmatpush3.msra.mxu0 %v5517_v13  ;;  %4261 = vmatpush3.msra.mxu1 %v4364_v35  ;;  %v4374_v13 = vld [vmem:[%s6187_s3 + $0xa0] sm:$0xff] }
 0xa4b   :  { %4227 = vmatprep.subr.mxu0 %v4393_v2  ;;  %4262 = vmatprep.subr.mxu1 %v4393_v2 }
 0xa4c   :  { %4228 = vmatpush3.msra.mxu0 %v5526_v33  ;;  %4263 = vmatpush3.msra.mxu1 %v4365_v47  ;;  %v4375_v33 = vld [vmem:[%s6187_s3 + $0x98] sm:$0xff] }
 0xa4d   :  { %4229 = vmatprep.subr.mxu0 %v4393_v2  ;;  %4264 = vmatprep.subr.mxu1 %v4393_v2 }
 0xa4e   :  { %4230 = vmatpush3.msra.mxu0 %v5533_v36  ;;  %4265 = vmatpush3.msra.mxu1 %v4366_v51  ;;  %v4376_v36 = vld [vmem:[%s6187_s3 + $0x90] sm:$0xff] }
 0xa4f   :  { %4231 = vmatprep.subr.mxu0 %v4393_v2  ;;  %4266 = vmatprep.subr.mxu1 %v4393_v2 }
 0xa50   :  { %4232 = vmatpush3.msra.mxu0 %v5540_v37  ;;  %4267 = vmatpush3.msra.mxu1 %v4367_v58  ;;  %v4377_v37 = vld [vmem:[%s6187_s3 + $0x88] sm:$0xff] }
 0xa51   :  { %4233 = vmatprep.subr.mxu0 %v4393_v2  ;;  %4268 = vmatprep.subr.mxu1 %v4393_v2 }
 0xa52   :  { %4234 = vmatpush3.msra.mxu0 %v5547_v38  ;;  %4269 = vmatpush3.msra.mxu1 %v4368_v61  ;;  %v4378_v38 = vld [vmem:[%s6187_s3 + $0x80] sm:$0xff] }
 0xa53   :  { %4235 = vmatprep.subr.mxu0 %v4393_v2  ;;  %4270 = vmatprep.subr.mxu1 %v4393_v2 }
 0xa54   :  { %4236 = vmatpush3.msra.mxu0 %v5554_v39  ;;  %4271 = vmatpush3.msra.mxu1 %v4369_v3  ;;  %v1221_v39 = vadd.f32 %v5601_v50, %v5504_v18  ;;  %v4380_v18 = vld [vmem:[%s6192_s6 + $0x70] sm:$0xff]  ;;  %v4381_v50 = vld [vmem:[%s6192_s6 + $0x68] sm:$0xff] }
 0xa55   :  { %4237 = vmatprep.subr.mxu0 %v4393_v2  ;;  %4272 = vmatprep.subr.mxu1 %v4393_v2 }
 0xa56   :  { %4238 = vmatpush3.msra.mxu0 %v5561_v40  ;;  %4273 = vmatpush3.msra.mxu1 %v4370_v8 }
 0xa57   :  { %4239 = vmatprep.subr.mxu0 %v4393_v2  ;;  %4274 = vmatprep.subr.mxu1 %v4393_v2 }
 0xa58   :  { %4240 = vmatpush3.msra.mxu0 %v5568_v41  ;;  %4275 = vmatpush3.msra.mxu1 %v4371_v63 }
 0xa59   :  { %4241 = vmatprep.subr.mxu0 %v4393_v2  ;;  %4276 = vmatprep.subr.mxu1 %v4393_v2 }
 0xa5a   :  { %4242 = vmatpush3.msra.mxu0 %v5575_v42  ;;  %4277 = vmatpush3.msra.mxu1 %v4372_v1 }
 0xa5b   :  { %4243 = vmatprep.subr.mxu0 %v4393_v2  ;;  %4278 = vmatprep.subr.mxu1 %v4393_v2 }
 0xa5c   :  { %4244 = vmatpush3.msra.mxu0 %v5582_v43  ;;  %4279 = vmatpush3.msra.mxu1 %v4373_v31 }
 0xa5d   :  { %4245 = vmatprep.subr.mxu0 %v4393_v2  ;;  %4280 = vmatprep.subr.mxu1 %v4393_v2 }
 0xa5e   :  { %4246 = vmatpush3.msra.mxu0 %v5589_v46  ;;  %4281 = vmatpush3.msra.mxu1 %v4374_v13 }
 0xa5f   :  { %4247 = vmatprep.subr.mxu0 %v4393_v2  ;;  %4282 = vmatprep.subr.mxu1 %v4393_v2 }
 0xa60   :  { %4248 = vmatpush3.msra.mxu0 %v5596_v48  ;;  %4283 = vmatpush3.msra.mxu1 %v4375_v33 }
 0xa61   :  { %4249 = vmatprep.subr.mxu0 %v4393_v2  ;;  %4284 = vmatprep.subr.mxu1 %v4393_v2 }
 0xa62   :  { %4250 = vmatpush3.msra.mxu0 %v5608_v52  ;;  %4285 = vmatpush3.msra.mxu1 %v4376_v36 }
 0xa63   :  { %4251 = vmatprep.subr.mxu0 %v4393_v2  ;;  %4286 = vmatprep.subr.mxu1 %v4393_v2 }
 0xa64   :  { %4252 = vmatpush3.msra.mxu0 %v5617_v9  ;;  %4287 = vmatpush3.msra.mxu1 %v4377_v37 }
 0xa65   :  { %4253 = vmatprep.subr.mxu0 %v4393_v2  ;;  %4288 = vmatprep.subr.mxu1 %v4393_v2 }
 0xa66   :  { %4254 = vmatpush3.msra.mxu0 %v5624_v29  ;;  %4255 = vmatprep.mubr.msk.f32.mxu0 %vm4394_vm0, %v4393_v2 }
 0xa67   :  { %4289 = vmatpush3.msra.mxu1 %v4378_v38  ;;  %4290 = vmatprep.mubr.msk.f32.mxu1 %vm4394_vm0, %v4393_v2 }
 0xa68   :  { %4293 = vmatprep.subr.mxu0 %v4393_v2 }
 0xb07   :  { %v2271_v40 = vpop.f32.mrf.mxu0  ;;  %v2343_v41 = vpop.f32.mrf.mxu1 }
 0xb08   :  { %v2272_v42 = vadd.f32 %v5703_v55, %v2271_v40  ;;  %v2347_v43 = vadd.f32 %v2343_v41, %v1221_v39 }
 0xb09   :  { %v4187_v46 = vpop.f32.mrf.mxu0  ;;  %v4222_v48 = vpop.f32.mrf.mxu1 }
 0xb0a   :  { %2275 = vst [vmem:[%s6195_s8 + $0x28] sm:$0xff] %v2272_v42  ;;  %v2348_v11 = vmax.f32 %v2347_v43, 0.0 }
 0xb0c   :  { %4256 = vmatmul.mubr.f32.vlgmr.msra.gmra.mxu0 %v2348_v11  ;;  %4291 = vmatmul.mubr.f32.vlgmr.msra.gmra.mxu1 %v2348_v11 }
 0xb0d   :  { %4294 = vmatpush3.msra.mxu0 %v4379_v32  ;;  %4325 = vmatprep.mubr.msk.f32.mxu0 %vm4394_vm0, %v4393_v2 }
 0xb0e   :  { %4295 = vmatprep.subr.mxu0 %v4393_v2 }
 0xb0f   :  { %4296 = vmatpush3.msra.mxu0 %v4380_v18 }
 0xb10   :  { %4297 = vmatprep.subr.mxu0 %v4393_v2 }
 0xb11   :  { %4298 = vmatpush3.msra.mxu0 %v4381_v50 }
 0xb12   :  { %4299 = vmatprep.subr.mxu0 %v4393_v2 }
 0xb13   :  { %4300 = vmatpush3.msra.mxu0 %v4382_v17 }
 0xb14   :  { %4301 = vmatprep.subr.mxu0 %v4393_v2 }
 0xb15   :  { %4302 = vmatpush3.msra.mxu0 %v4383_v12 }
 0xb16   :  { %4303 = vmatprep.subr.mxu0 %v4393_v2 }
 0xb17   :  { %4304 = vmatpush3.msra.mxu0 %v4384_v16 }
 0xb18   :  { %4305 = vmatprep.subr.mxu0 %v4393_v2 }
 0xb19   :  { %4306 = vmatpush3.msra.mxu0 %v4385_v20 }
 0xb1a   :  { %4307 = vmatprep.subr.mxu0 %v4393_v2 }
 0xb1b   :  { %4308 = vmatpush3.msra.mxu0 %v4386_v22 }
 0xb1c   :  { %4309 = vmatprep.subr.mxu0 %v4393_v2 }
 0xb1d   :  { %4310 = vmatpush3.msra.mxu0 %v4387_v24 }
 0xb1e   :  { %4311 = vmatprep.subr.mxu0 %v4393_v2 }
 0xb1f   :  { %4312 = vmatpush3.msra.mxu0 %v4388_v26 }
 0xb20   :  { %4313 = vmatprep.subr.mxu0 %v4393_v2 }
 0xb21   :  { %4314 = vmatpush3.msra.mxu0 %v4389_v53 }
 0xb22   :  { %4315 = vmatprep.subr.mxu0 %v4393_v2 }
 0xb23   :  { %4316 = vmatpush3.msra.mxu0 %v4390_v28 }
 0xb24   :  { %4317 = vmatprep.subr.mxu0 %v4393_v2 }
 0xb25   :  { %4318 = vmatpush3.msra.mxu0 %v4391_v54 }
 0xb26   :  { %4319 = vmatprep.subr.mxu0 %v4393_v2 }
 0xb27   :  { %4320 = vmatpush3.msra.mxu0 %v5608_v52 }
 0xb28   :  { %4321 = vmatprep.subr.mxu0 %v4393_v2 }
 0xb29   :  { %4322 = vmatpush3.msra.mxu0 %v5617_v9 }
 0xb2a   :  { %4323 = vmatprep.subr.mxu0 %v4393_v2 }
 0xb2b   :  { %4324 = vmatpush3.msra.mxu0 %v5624_v29 }
 0xbcc   :  { %v2415_v34 = vpop.f32.mrf.mxu0  ;;  %v2487_v19 = vpop.f32.mrf.mxu1 }
 0xbcd   :  { %v2416_v49 = vadd.f32 %v5703_v55, %v2415_v34  ;;  %v2491_v4 = vadd.f32 %v2487_v19, %v1365_v25 }
 0xbce   :  { %v4257_v52 = vpop.f32.mrf.mxu0  ;;  %v4292_v59 = vpop.f32.mrf.mxu1 }
 0xbcf   :  { %2419 = vst [vmem:[%s6195_s8 + $0x30] sm:$0xff] %v2416_v49  ;;  %v2492_v2 = vmax.f32 %v2491_v4, 0.0 }
 0xbd1   :  { %2595 = vst [vmem:[%s6193_s9 + $0x8] sm:$0xff] %v2492_v2  ;;  %4326 = vmatmul.mubr.f32.vlgmr.msra.gmra.mxu0 %v2492_v2 }
 0xc91   :  { %v2559_v9 = vpop.f32.mrf.mxu0 }
 0xc92   :  { %v2560_v29 = vadd.f32 %v5703_v55, %v2559_v9 }
 0xc93   :  { %v4327_v45 = vpop.f32.mrf.mxu0 }
 0xc94   :  { %2563 = vst [vmem:[%s6195_s8 + $0x38] sm:$0xff] %v2560_v29 }

</bundles_post_ra>
